<compile_context>
chip_gen: v6e
topology: v6e:2x2x1
jax: 0.10.0
libtpu: 0.0.40
codegen_flags: <defaults>
</compile_context>

<pallas_src>
import functools

import jax
import jax.numpy as jnp
from jax.experimental import pallas as pl
from jax.experimental.pallas import tpu as pltpu

EPS = 1e-5
LANE = 128           # TPU lane width
TM = 256             # M tile (rows per grid step); fits v7x VMEM at ResNet sizes
_VMEM_LIMIT = 48 * 1024 * 1024


# -----------------------------------------------------------------------------
# Pallas kernels (GEMM + folded-BN affine [+ ReLU] [+ residual add])
# -----------------------------------------------------------------------------
def _make_gemm_affine_kernel(apply_relu):
    def kernel(a_ref, w_ref, scale_ref, shift_ref, o_ref, acc_ref):
        @pl.when(pl.program_id(1) == 0)
        def _():
            acc_ref[...] = jnp.zeros_like(acc_ref)

        acc_ref[...] += jnp.dot(a_ref[...], w_ref[...],
                                preferred_element_type=jnp.float32)

        @pl.when(pl.program_id(1) == pl.num_programs(1) - 1)
        def _():
            y = acc_ref[...] * scale_ref[...] + shift_ref[...]
            if apply_relu:
                y = jnp.maximum(y, 0.0)
            o_ref[...] = y.astype(o_ref.dtype)

    return kernel


def _gemm_bn_add_relu_kernel(a_ref, w_ref, scale_ref, shift_ref, id_ref,
                             o_ref, acc_ref):
    @pl.when(pl.program_id(1) == 0)
    def _():
        acc_ref[...] = jnp.zeros_like(acc_ref)

    acc_ref[...] += jnp.dot(a_ref[...], w_ref[...],
                            preferred_element_type=jnp.float32)

    @pl.when(pl.program_id(1) == pl.num_programs(1) - 1)
    def _():
        y = acc_ref[...] * scale_ref[...] + shift_ref[...] + id_ref[...]
        o_ref[...] = jnp.maximum(y, 0.0).astype(o_ref.dtype)


# -----------------------------------------------------------------------------
# pallas_call wrappers
# -----------------------------------------------------------------------------
def _round_up(x, m):
    return ((x + m - 1) // m) * m


def _choose_tk(k_pad):
    for c in (512, 256, 128):
        if k_pad % c == 0:
            return c
    return k_pad  # unreachable: k_pad is a multiple of 128


def _pad2d(x, rows, cols):
    pr, pc = rows - x.shape[0], cols - x.shape[1]
    if pr == 0 and pc == 0:
        return x
    return jnp.pad(x, ((0, pr), (0, pc)))


def _gemm_affine(a, w, scale, shift, *, apply_relu):
    """(M, K)bf16 @ (K, Co)bf16 -> affine (folded BN) [+ ReLU], f32 out. Padded shapes."""
    M, K = a.shape
    Co = w.shape[1]
    tk = _choose_tk(K)
    cost = pl.CostEstimate(
        flops=2 * M * K * Co,
        transcendentals=0,
        bytes_accessed=a.size * a.dtype.itemsize + w.size * w.dtype.itemsize
        + 2 * Co * 4 + M * Co * 4,
    )
    return pl.pallas_call(
        _make_gemm_affine_kernel(apply_relu),
        out_shape=jax.ShapeDtypeStruct((M, Co), jnp.float32),
        grid_spec=pltpu.PrefetchScalarGridSpec(
            num_scalar_prefetch=0,
            grid=(M // TM, K // tk),
            in_specs=[
                pl.BlockSpec((TM, tk), lambda i, k: (i, k)),
                pl.BlockSpec((tk, Co), lambda i, k: (k, 0)),
                pl.BlockSpec((1, Co), lambda i, k: (0, 0)),
                pl.BlockSpec((1, Co), lambda i, k: (0, 0)),
            ],
            out_specs=pl.BlockSpec((TM, Co), lambda i, k: (i, 0)),
            scratch_shapes=[pltpu.VMEM((TM, Co), jnp.float32)],
        ),
        compiler_params=pltpu.CompilerParams(
            dimension_semantics=("parallel", "arbitrary"),
            vmem_limit_bytes=_VMEM_LIMIT,
        ),
        cost_estimate=cost,
    )(a, w, scale, shift)


def _gemm_bn_add_relu(a, w, scale, shift, ident):
    """(M,K)bf16 @ (K,Co)bf16 -> BN affine + residual add (f32 ident) + ReLU."""
    M, K = a.shape
    Co = w.shape[1]
    tk = _choose_tk(K)
    cost = pl.CostEstimate(
        flops=2 * M * K * Co + 2 * M * Co,
        transcendentals=0,
        bytes_accessed=a.size * a.dtype.itemsize + w.size * w.dtype.itemsize
        + ident.size * 4 + 2 * Co * 4 + M * Co * 4,
    )
    return pl.pallas_call(
        _gemm_bn_add_relu_kernel,
        out_shape=jax.ShapeDtypeStruct((M, Co), jnp.float32),
        grid_spec=pltpu.PrefetchScalarGridSpec(
            num_scalar_prefetch=0,
            grid=(M // TM, K // tk),
            in_specs=[
                pl.BlockSpec((TM, tk), lambda i, k: (i, k)),
                pl.BlockSpec((tk, Co), lambda i, k: (k, 0)),
                pl.BlockSpec((1, Co), lambda i, k: (0, 0)),
                pl.BlockSpec((1, Co), lambda i, k: (0, 0)),
                pl.BlockSpec((TM, Co), lambda i, k: (i, 0)),
            ],
            out_specs=pl.BlockSpec((TM, Co), lambda i, k: (i, 0)),
            scratch_shapes=[pltpu.VMEM((TM, Co), jnp.float32)],
        ),
        compiler_params=pltpu.CompilerParams(
            dimension_semantics=("parallel", "arbitrary"),
            vmem_limit_bytes=_VMEM_LIMIT,
        ),
        cost_estimate=cost,
    )(a, w, scale, shift, ident)


# -----------------------------------------------------------------------------
# JAX glue: im2col patch extraction, BN folding, padding, layout transposes
# -----------------------------------------------------------------------------
def _im2col(x_nhwc, ksize, stride, padding):
    N, H, W, C = x_nhwc.shape
    Ho = (H + 2 * padding - ksize) // stride + 1
    Wo = (W + 2 * padding - ksize) // stride + 1
    xp = jnp.pad(x_nhwc, ((0, 0), (padding, padding), (padding, padding), (0, 0)))
    cols = []
    for ky in range(ksize):
        for kx in range(ksize):
            cols.append(xp[:, ky:ky + (Ho - 1) * stride + 1:stride,
                              kx:kx + (Wo - 1) * stride + 1:stride, :])
    patches = jnp.concatenate(cols, axis=-1)          # (N, Ho, Wo, k*k*C)
    return patches.reshape(N * Ho * Wo, ksize * ksize * C), (N, Ho, Wo)


def _fold_bn(gamma, beta, mean, var):
    scale = gamma / jnp.sqrt(var + EPS)
    shift = beta - mean * scale
    return scale.reshape(1, -1), shift.reshape(1, -1)


def residual_block_forward(x_nchw, params, stride=1):
    x = jnp.transpose(x_nchw, (0, 2, 3, 1)).astype(jnp.float32)   # NCHW -> NHWC
    N, H, W, Cin = x.shape
    Cout = params["w1"].shape[-1]
    Co_pad = _round_up(Cout, LANE)

    # ---- conv1 (3x3, stride, pad 1, no bias) -> BN1 -> ReLU  [Pallas GEMM] ----
    x_bf = x.astype(jnp.bfloat16)                     # bf16 MXU operands, half HBM bytes
    a1, (_, Ho, Wo) = _im2col(x_bf, 3, stride, 1)
    M = N * Ho * Wo
    M_pad = _round_up(M, 2 * TM)                      # even parallel grid for v7x
    K1 = 9 * Cin
    K1_pad = _round_up(K1, LANE)
    a1p = _pad2d(a1, M_pad, K1_pad)
    w1p = _pad2d(params["w1"].reshape(K1, Cout), K1_pad, Co_pad).astype(jnp.bfloat16)
    s1, b1 = _fold_bn(params["bn1_gamma"], params["bn1_beta"],
                      params["bn1_mean"], params["bn1_var"])
    y1 = _gemm_affine(a1p, w1p, _pad2d(s1, 1, Co_pad), _pad2d(b1, 1, Co_pad),
                      apply_relu=True)                # (M_pad, Co_pad) f32
    y1_img = y1[:M, :Cout].reshape(N, Ho, Wo, Cout)

    # ---- identity / downsample branch ----
    need_ds = (stride != 1) or (Cout != Cin)
    if need_ds:
        xd = x_bf[:, ::stride, ::stride, :].reshape(M, Cin)
        Cd_pad = _round_up(Cin, LANE)
        xdp = _pad2d(xd, M_pad, Cd_pad)
        wdp = _pad2d(params["wd"], Cd_pad, Co_pad).astype(jnp.bfloat16)
        sd, shd = _fold_bn(params["bnd_gamma"], params["bnd_beta"],
                           params["bnd_mean"], params["bnd_var"])
        # fold 1x1-conv bias into the BN shift: (y + bd)*sd + shd == y*sd + (bd*sd + shd)
        shd_tot = params["bd"].reshape(1, -1) * sd + shd
        ident = _gemm_affine(xdp, wdp, _pad2d(sd, 1, Co_pad),
                             _pad2d(shd_tot, 1, Co_pad), apply_relu=False)
    else:
        # Cin == Cout and stride == 1: plain residual, added directly (no eye matmul).
        ident = _pad2d(x.reshape(M, Cin), M_pad, Co_pad)

    # ---- conv2 (3x3, stride 1) -> BN2, fused with residual add + ReLU ----
    a2, _ = _im2col(y1_img.astype(jnp.bfloat16), 3, 1, 1)
    K2 = 9 * Cout
    K2_pad = _round_up(K2, LANE)
    a2p = _pad2d(a2, M_pad, K2_pad)
    w2p = _pad2d(params["w2"].reshape(K2, Cout), K2_pad, Co_pad).astype(jnp.bfloat16)
    s2, b2 = _fold_bn(params["bn2_gamma"], params["bn2_beta"],
                      params["bn2_mean"], params["bn2_var"])
    out = _gemm_bn_add_relu(a2p, w2p, _pad2d(s2, 1, Co_pad), _pad2d(b2, 1, Co_pad),
                            ident)
    out_img = out[:M, :Cout].reshape(N, Ho, Wo, Cout)
    return jnp.transpose(out_img, (0, 3, 1, 2))       # NHWC -> NCHW


# -----------------------------------------------------------------------------
# Pure-JAX reference (XLA convs, f32) for a correctness check
# -----------------------------------------------------------------------------
def _reference(x_nchw, params, stride=1):
    x = jnp.transpose(x_nchw, (0, 2, 3, 1)).astype(jnp.float32)
    dn = ("NHWC", "HWIO", "NHWC")

    def bn(y, g, b, m, v):
        return (y - m) / jnp.sqrt(v + EPS) * g + b

    f = jax.lax.conv_general_dilated(x, params["w1"], (stride, stride),
                                     [(1, 1), (1, 1)], dimension_numbers=dn)
    f = jnp.maximum(bn(f, params["bn1_gamma"], params["bn1_beta"],
                       params["bn1_mean"], params["bn1_var"]), 0.0)
    f = jax.lax.conv_general_dilated(f, params["w2"], (1, 1),
                                     [(1, 1), (1, 1)], dimension_numbers=dn)
    f = bn(f, params["bn2_gamma"], params["bn2_beta"],
           params["bn2_mean"], params["bn2_var"])

    Cin = x.shape[-1]
    Cout = params["w1"].shape[-1]
    if stride != 1 or Cout != Cin:
        ident = jax.lax.conv_general_dilated(
            x, params["wd"].reshape(1, 1, Cin, Cout), (stride, stride),
            [(0, 0), (0, 0)], dimension_numbers=dn) + params["bd"]
        ident = bn(ident, params["bnd_gamma"], params["bnd_beta"],
                   params["bnd_mean"], params["bnd_var"])
    else:
        ident = x
    h = jnp.maximum(f + ident, 0.0)
    return jnp.transpose(h, (0, 3, 1, 2))


if __name__ == "__main__":
    key = jax.random.PRNGKey(0)
    ks = jax.random.split(key, 20)
    Cin, Cout, Hsp, Wsp, Nb, stride = 4, 8, 16, 16, 2, 1

    def nrm(k, shape, s=0.1):
        return s * jax.random.normal(k, shape, jnp.float32)

    params = dict(
        w1=nrm(ks[0], (3, 3, Cin, Cout)),
        bn1_gamma=1.0 + nrm(ks[1], (Cout,)),
        bn1_beta=nrm(ks[2], (Cout,)),
        bn1_mean=nrm(ks[3], (Cout,)),
        bn1_var=1.0 + 0.1 * jnp.abs(jax.random.normal(ks[4], (Cout,), jnp.float32)),
        w2=nrm(ks[5], (3, 3, Cout, Cout)),
        bn2_gamma=1.0 + nrm(ks[6], (Cout,)),
        bn2_beta=nrm(ks[7], (Cout,)),
        bn2_mean=nrm(ks[8], (Cout,)),
        bn2_var=1.0 + 0.1 * jnp.abs(jax.random.normal(ks[9], (Cout,), jnp.float32)),
        wd=nrm(ks[10], (Cin, Cout)),
        bd=nrm(ks[11], (Cout,)),
        bnd_gamma=1.0 + nrm(ks[12], (Cout,)),
        bnd_beta=nrm(ks[13], (Cout,)),
        bnd_mean=nrm(ks[14], (Cout,)),
        bnd_var=1.0 + 0.1 * jnp.abs(jax.random.normal(ks[15], (Cout,), jnp.float32)),
    )

    x = jax.random.normal(ks[16], (Nb, Cin, Hsp, Wsp), jnp.float32)

    fwd = jax.jit(functools.partial(residual_block_forward, params=params, stride=stride))
    out = jax.block_until_ready(fwd(x))

    ref = jax.block_until_ready(_reference(x, params, stride=stride))
    max_err = float(jnp.max(jnp.abs(out - ref)))
    assert out.shape == (Nb, Cout, Hsp // stride, Wsp // stride), out.shape
    # bf16 MXU operands vs f32 XLA reference: allow a few 1e-2 of absolute error.
    assert max_err < 5e-2, f"max abs error {max_err}"
    print("KERNEL_OK")
</pallas_src>

<mosaic_0001>
module attributes {stable_mosaic.version = 11 : i64} {
  func.func @kernel(%arg0: i32, %arg1: i32, %arg2: memref<256x128xbf16, #tpu.memory_space<vmem>>, %arg3: memref<128x128xbf16, #tpu.memory_space<vmem>>, %arg4: memref<1x128xf32, #tpu.memory_space<vmem>>, %arg5: memref<1x128xf32, #tpu.memory_space<vmem>>, %arg6: memref<256x128xf32, #tpu.memory_space<vmem>>, %arg7: memref<256x128xf32, #tpu.memory_space<vmem>>) attributes {dimension_semantics = [#tpu.dimension_semantics<parallel>, #tpu.dimension_semantics<arbitrary>], iteration_bounds = array<i64: 2, 1>, scalar_prefetch = 0 : i64, scratch_operands = 1 : i64, tpu.core_type = #tpu.core_type<tc>, window_params = [{transform_indices = @transform_0, window_bounds = array<i64: 256, 128>}, {transform_indices = @transform_1, window_bounds = array<i64: 128, 128>}, {pipeline_mode = #tpu.pipeline_mode<synchronous>, transform_indices = @transform_2, window_bounds = array<i64: 1, 128>}, {pipeline_mode = #tpu.pipeline_mode<synchronous>, transform_indices = @transform_3, window_bounds = array<i64: 1, 128>}, {transform_indices = @transform_4, window_bounds = array<i64: 256, 128>}]} {
    %c0_i32 = arith.constant 0 : i32
    %0 = arith.cmpi eq, %arg1, %c0_i32 : i32
    %1 = arith.extui %0 : i1 to i32
    %c0_i32_0 = arith.constant 0 : i32
    %2 = arith.cmpi ne, %1, %c0_i32_0 : i32
    scf.if %2 {
      %cst_10 = arith.constant 0.000000e+00 : f32
      %12 = vector.broadcast %cst_10 : f32 to vector<256x128xf32>
      %c0_11 = arith.constant 0 : index
      %c0_12 = arith.constant 0 : index
      %13 = vector.load %arg7[%c0_11, %c0_12] : memref<256x128xf32, #tpu.memory_space<vmem>>, vector<256x128xf32>
      tpu.vector_store %arg7[%c0_11, %c0_12], %12 {strides = array<i32>} : memref<256x128xf32, #tpu.memory_space<vmem>>, vector<256x128xf32>,
    } else {
    }
    %c0 = arith.constant 0 : index
    %c0_1 = arith.constant 0 : index
    %3 = vector.load %arg7[%c0, %c0_1] : memref<256x128xf32, #tpu.memory_space<vmem>>, vector<256x128xf32>
    %c0_2 = arith.constant 0 : index
    %c0_3 = arith.constant 0 : index
    %4 = vector.load %arg2[%c0_2, %c0_3] : memref<256x128xbf16, #tpu.memory_space<vmem>>, vector<256x128xbf16>
    %c0_4 = arith.constant 0 : index
    %c0_5 = arith.constant 0 : index
    %5 = vector.load %arg3[%c0_4, %c0_5] : memref<128x128xbf16, #tpu.memory_space<vmem>>, vector<128x128xbf16>
    %cst = arith.constant dense<0.000000e+00> : vector<256x128xf32>
    %6 = tpu.matmul %4, %5, %cst {dimension_numbers = #tpu.dot_dimension_numbers<[1], [0], [0], [1], [0, 0, 1, 1], [], []>} : vector<256x128xbf16>, vector<128x128xbf16>, vector<256x128xf32> -> vector<256x128xf32>
    %7 = arith.addf %3, %6 : vector<256x128xf32>
    %c0_6 = arith.constant 0 : index
    %c0_7 = arith.constant 0 : index
    %8 = vector.load %arg7[%c0_6, %c0_7] : memref<256x128xf32, #tpu.memory_space<vmem>>, vector<256x128xf32>
    tpu.vector_store %arg7[%c0_6, %c0_7], %7 {strides = array<i32>} : memref<256x128xf32, #tpu.memory_space<vmem>>, vector<256x128xf32>,
    %c0_i32_8 = arith.constant 0 : i32
    %9 = arith.cmpi eq, %arg1, %c0_i32_8 : i32
    %10 = arith.extui %9 : i1 to i32
    %c0_i32_9 = arith.constant 0 : i32
    %11 = arith.cmpi ne, %10, %c0_i32_9 : i32
    scf.if %11 {
      %c0_10 = arith.constant 0 : index
      %c0_11 = arith.constant 0 : index
      %12 = vector.load %arg7[%c0_10, %c0_11] : memref<256x128xf32, #tpu.memory_space<vmem>>, vector<256x128xf32>
      %c0_12 = arith.constant 0 : index
      %c0_13 = arith.constant 0 : index
      %13 = vector.load %arg4[%c0_12, %c0_13] : memref<1x128xf32, #tpu.memory_space<vmem>>, vector<1x128xf32>
      %14 = vector.broadcast %13 : vector<1x128xf32> to vector<256x128xf32>
      %15 = arith.mulf %12, %14 : vector<256x128xf32>
      %c0_14 = arith.constant 0 : index
      %c0_15 = arith.constant 0 : index
      %16 = vector.load %arg5[%c0_14, %c0_15] : memref<1x128xf32, #tpu.memory_space<vmem>>, vector<1x128xf32>
      %17 = vector.broadcast %16 : vector<1x128xf32> to vector<256x128xf32>
      %18 = arith.addf %15, %17 : vector<256x128xf32>
      %cst_16 = arith.constant 0.000000e+00 : f32
      %19 = vector.broadcast %cst_16 : f32 to vector<256x128xf32>
      %20 = arith.maximumf %18, %19 : vector<256x128xf32>
      %c0_17 = arith.constant 0 : index
      %c0_18 = arith.constant 0 : index
      %21 = vector.load %arg6[%c0_17, %c0_18] : memref<256x128xf32, #tpu.memory_space<vmem>>, vector<256x128xf32>
      tpu.vector_store %arg6[%c0_17, %c0_18], %20 {strides = array<i32>} : memref<256x128xf32, #tpu.memory_space<vmem>>, vector<256x128xf32>,
    } else {
    }
    return
  }
  func.func @transform_0(%arg0: i32, %arg1: i32) -> (i32, i32) {
    %c0_i32 = arith.constant 0 : i32
    return %arg0, %arg1 : i32, i32
  }
  func.func @transform_1(%arg0: i32, %arg1: i32) -> (i32, i32) {
    %c0_i32 = arith.constant 0 : i32
    %c0_i32_0 = arith.constant 0 : i32
    return %arg1, %c0_i32 : i32, i32
  }
  func.func @transform_2(%arg0: i32, %arg1: i32) -> (i32, i32) {
    %c0_i32 = arith.constant 0 : i32
    %c0_i32_0 = arith.constant 0 : i32
    %c0_i32_1 = arith.constant 0 : i32
    return %c0_i32, %c0_i32_0 : i32, i32
  }
  func.func @transform_3(%arg0: i32, %arg1: i32) -> (i32, i32) {
    %c0_i32 = arith.constant 0 : i32
    %c0_i32_0 = arith.constant 0 : i32
    %c0_i32_1 = arith.constant 0 : i32
    return %c0_i32, %c0_i32_0 : i32, i32
  }
  func.func @transform_4(%arg0: i32, %arg1: i32) -> (i32, i32) {
    %c0_i32 = arith.constant 0 : i32
    %c0_i32_0 = arith.constant 0 : i32
    return %arg0, %c0_i32 : i32, i32
  }
}

module attributes {stable_mosaic.version = 11 : i64} {
  func.func @kernel(%arg0: i32, %arg1: i32, %arg2: memref<256x128xbf16, #tpu.memory_space<vmem>>, %arg3: memref<128x128xbf16, #tpu.memory_space<vmem>>, %arg4: memref<1x128xf32, #tpu.memory_space<vmem>>, %arg5: memref<1x128xf32, #tpu.memory_space<vmem>>, %arg6: memref<256x128xf32, #tpu.memory_space<vmem>>, %arg7: memref<256x128xf32, #tpu.memory_space<vmem>>) attributes {dimension_semantics = [#tpu.dimension_semantics<parallel>, #tpu.dimension_semantics<arbitrary>], iteration_bounds = array<i64: 2, 1>, scalar_prefetch = 0 : i64, scratch_operands = 1 : i64, tpu.core_type = #tpu.core_type<tc>, window_params = [{transform_indices = @transform_0, window_bounds = array<i64: 256, 128>}, {transform_indices = @transform_1, window_bounds = array<i64: 128, 128>}, {pipeline_mode = #tpu.pipeline_mode<synchronous>, transform_indices = @transform_2, window_bounds = array<i64: 1, 128>}, {pipeline_mode = #tpu.pipeline_mode<synchronous>, transform_indices = @transform_3, window_bounds = array<i64: 1, 128>}, {transform_indices = @transform_4, window_bounds = array<i64: 256, 128>}]} {
    %c0_i32 = arith.constant 0 : i32
    %0 = arith.cmpi eq, %arg1, %c0_i32 : i32
    %1 = arith.extui %0 : i1 to i32
    %c0_i32_0 = arith.constant 0 : i32
    %2 = arith.cmpi ne, %1, %c0_i32_0 : i32
    scf.if %2 {
      %cst_10 = arith.constant 0.000000e+00 : f32
      %12 = vector.broadcast %cst_10 : f32 to vector<256x128xf32>
      %c0_11 = arith.constant 0 : index
      %c0_12 = arith.constant 0 : index
      %13 = vector.load %arg7[%c0_11, %c0_12] : memref<256x128xf32, #tpu.memory_space<vmem>>, vector<256x128xf32>
      tpu.vector_store %arg7[%c0_11, %c0_12], %12 {strides = array<i32>} : memref<256x128xf32, #tpu.memory_space<vmem>>, vector<256x128xf32>,
    } else {
    }
    %c0 = arith.constant 0 : index
    %c0_1 = arith.constant 0 : index
    %3 = vector.load %arg7[%c0, %c0_1] : memref<256x128xf32, #tpu.memory_space<vmem>>, vector<256x128xf32>
    %c0_2 = arith.constant 0 : index
    %c0_3 = arith.constant 0 : index
    %4 = vector.load %arg2[%c0_2, %c0_3] : memref<256x128xbf16, #tpu.memory_space<vmem>>, vector<256x128xbf16>
    %c0_4 = arith.constant 0 : index
    %c0_5 = arith.constant 0 : index
    %5 = vector.load %arg3[%c0_4, %c0_5] : memref<128x128xbf16, #tpu.memory_space<vmem>>, vector<128x128xbf16>
    %cst = arith.constant dense<0.000000e+00> : vector<256x128xf32>
    %6 = tpu.matmul %4, %5, %cst {dimension_numbers = #tpu.dot_dimension_numbers<[1], [0], [0], [1], [0, 0, 1, 1], [], []>} : vector<256x128xbf16>, vector<128x128xbf16>, vector<256x128xf32> -> vector<256x128xf32>
    %7 = arith.addf %3, %6 : vector<256x128xf32>
    %c0_6 = arith.constant 0 : index
    %c0_7 = arith.constant 0 : index
    %8 = vector.load %arg7[%c0_6, %c0_7] : memref<256x128xf32, #tpu.memory_space<vmem>>, vector<256x128xf32>
    tpu.vector_store %arg7[%c0_6, %c0_7], %7 {strides = array<i32>} : memref<256x128xf32, #tpu.memory_space<vmem>>, vector<256x128xf32>,
    %c0_i32_8 = arith.constant 0 : i32
    %9 = arith.cmpi eq, %arg1, %c0_i32_8 : i32
    %10 = arith.extui %9 : i1 to i32
    %c0_i32_9 = arith.constant 0 : i32
    %11 = arith.cmpi ne, %10, %c0_i32_9 : i32
    scf.if %11 {
      %c0_10 = arith.constant 0 : index
      %c0_11 = arith.constant 0 : index
      %12 = vector.load %arg7[%c0_10, %c0_11] : memref<256x128xf32, #tpu.memory_space<vmem>>, vector<256x128xf32>
      %c0_12 = arith.constant 0 : index
      %c0_13 = arith.constant 0 : index
      %13 = vector.load %arg4[%c0_12, %c0_13] : memref<1x128xf32, #tpu.memory_space<vmem>>, vector<1x128xf32>
      %14 = vector.broadcast %13 : vector<1x128xf32> to vector<256x128xf32>
      %15 = arith.mulf %12, %14 : vector<256x128xf32>
      %c0_14 = arith.constant 0 : index
      %c0_15 = arith.constant 0 : index
      %16 = vector.load %arg5[%c0_14, %c0_15] : memref<1x128xf32, #tpu.memory_space<vmem>>, vector<1x128xf32>
      %17 = vector.broadcast %16 : vector<1x128xf32> to vector<256x128xf32>
      %18 = arith.addf %15, %17 : vector<256x128xf32>
      %c0_16 = arith.constant 0 : index
      %c0_17 = arith.constant 0 : index
      %19 = vector.load %arg6[%c0_16, %c0_17] : memref<256x128xf32, #tpu.memory_space<vmem>>, vector<256x128xf32>
      tpu.vector_store %arg6[%c0_16, %c0_17], %18 {strides = array<i32>} : memref<256x128xf32, #tpu.memory_space<vmem>>, vector<256x128xf32>,
    } else {
    }
    return
  }
  func.func @transform_0(%arg0: i32, %arg1: i32) -> (i32, i32) {
    %c0_i32 = arith.constant 0 : i32
    return %arg0, %arg1 : i32, i32
  }
  func.func @transform_1(%arg0: i32, %arg1: i32) -> (i32, i32) {
    %c0_i32 = arith.constant 0 : i32
    %c0_i32_0 = arith.constant 0 : i32
    return %arg1, %c0_i32 : i32, i32
  }
  func.func @transform_2(%arg0: i32, %arg1: i32) -> (i32, i32) {
    %c0_i32 = arith.constant 0 : i32
    %c0_i32_0 = arith.constant 0 : i32
    %c0_i32_1 = arith.constant 0 : i32
    return %c0_i32, %c0_i32_0 : i32, i32
  }
  func.func @transform_3(%arg0: i32, %arg1: i32) -> (i32, i32) {
    %c0_i32 = arith.constant 0 : i32
    %c0_i32_0 = arith.constant 0 : i32
    %c0_i32_1 = arith.constant 0 : i32
    return %c0_i32, %c0_i32_0 : i32, i32
  }
  func.func @transform_4(%arg0: i32, %arg1: i32) -> (i32, i32) {
    %c0_i32 = arith.constant 0 : i32
    %c0_i32_0 = arith.constant 0 : i32
    return %arg0, %c0_i32 : i32, i32
  }
}

module attributes {stable_mosaic.version = 11 : i64} {
  func.func @_gemm_bn_add_relu_kernel(%arg0: i32, %arg1: i32, %arg2: memref<256x128xbf16, #tpu.memory_space<vmem>>, %arg3: memref<128x128xbf16, #tpu.memory_space<vmem>>, %arg4: memref<1x128xf32, #tpu.memory_space<vmem>>, %arg5: memref<1x128xf32, #tpu.memory_space<vmem>>, %arg6: memref<256x128xf32, #tpu.memory_space<vmem>>, %arg7: memref<256x128xf32, #tpu.memory_space<vmem>>, %arg8: memref<256x128xf32, #tpu.memory_space<vmem>>) attributes {dimension_semantics = [#tpu.dimension_semantics<parallel>, #tpu.dimension_semantics<arbitrary>], iteration_bounds = array<i64: 2, 1>, scalar_prefetch = 0 : i64, scratch_operands = 1 : i64, tpu.core_type = #tpu.core_type<tc>, window_params = [{transform_indices = @transform_0, window_bounds = array<i64: 256, 128>}, {transform_indices = @transform_1, window_bounds = array<i64: 128, 128>}, {pipeline_mode = #tpu.pipeline_mode<synchronous>, transform_indices = @transform_2, window_bounds = array<i64: 1, 128>}, {pipeline_mode = #tpu.pipeline_mode<synchronous>, transform_indices = @transform_3, window_bounds = array<i64: 1, 128>}, {transform_indices = @transform_4, window_bounds = array<i64: 256, 128>}, {transform_indices = @transform_5, window_bounds = array<i64: 256, 128>}]} {
    %c0_i32 = arith.constant 0 : i32
    %0 = arith.cmpi eq, %arg1, %c0_i32 : i32
    %1 = arith.extui %0 : i1 to i32
    %c0_i32_0 = arith.constant 0 : i32
    %2 = arith.cmpi ne, %1, %c0_i32_0 : i32
    scf.if %2 {
      %cst_10 = arith.constant 0.000000e+00 : f32
      %12 = vector.broadcast %cst_10 : f32 to vector<256x128xf32>
      %c0_11 = arith.constant 0 : index
      %c0_12 = arith.constant 0 : index
      %13 = vector.load %arg8[%c0_11, %c0_12] : memref<256x128xf32, #tpu.memory_space<vmem>>, vector<256x128xf32>
      tpu.vector_store %arg8[%c0_11, %c0_12], %12 {strides = array<i32>} : memref<256x128xf32, #tpu.memory_space<vmem>>, vector<256x128xf32>,
    } else {
    }
    %c0 = arith.constant 0 : index
    %c0_1 = arith.constant 0 : index
    %3 = vector.load %arg8[%c0, %c0_1] : memref<256x128xf32, #tpu.memory_space<vmem>>, vector<256x128xf32>
    %c0_2 = arith.constant 0 : index
    %c0_3 = arith.constant 0 : index
    %4 = vector.load %arg2[%c0_2, %c0_3] : memref<256x128xbf16, #tpu.memory_space<vmem>>, vector<256x128xbf16>
    %c0_4 = arith.constant 0 : index
    %c0_5 = arith.constant 0 : index
    %5 = vector.load %arg3[%c0_4, %c0_5] : memref<128x128xbf16, #tpu.memory_space<vmem>>, vector<128x128xbf16>
    %cst = arith.constant dense<0.000000e+00> : vector<256x128xf32>
    %6 = tpu.matmul %4, %5, %cst {dimension_numbers = #tpu.dot_dimension_numbers<[1], [0], [0], [1], [0, 0, 1, 1], [], []>} : vector<256x128xbf16>, vector<128x128xbf16>, vector<256x128xf32> -> vector<256x128xf32>
    %7 = arith.addf %3, %6 : vector<256x128xf32>
    %c0_6 = arith.constant 0 : index
    %c0_7 = arith.constant 0 : index
    %8 = vector.load %arg8[%c0_6, %c0_7] : memref<256x128xf32, #tpu.memory_space<vmem>>, vector<256x128xf32>
    tpu.vector_store %arg8[%c0_6, %c0_7], %7 {strides = array<i32>} : memref<256x128xf32, #tpu.memory_space<vmem>>, vector<256x128xf32>,
    %c0_i32_8 = arith.constant 0 : i32
    %9 = arith.cmpi eq, %arg1, %c0_i32_8 : i32
    %10 = arith.extui %9 : i1 to i32
    %c0_i32_9 = arith.constant 0 : i32
    %11 = arith.cmpi ne, %10, %c0_i32_9 : i32
    scf.if %11 {
      %c0_10 = arith.constant 0 : index
      %c0_11 = arith.constant 0 : index
      %12 = vector.load %arg8[%c0_10, %c0_11] : memref<256x128xf32, #tpu.memory_space<vmem>>, vector<256x128xf32>
      %c0_12 = arith.constant 0 : index
      %c0_13 = arith.constant 0 : index
      %13 = vector.load %arg4[%c0_12, %c0_13] : memref<1x128xf32, #tpu.memory_space<vmem>>, vector<1x128xf32>
      %14 = vector.broadcast %13 : vector<1x128xf32> to vector<256x128xf32>
      %15 = arith.mulf %12, %14 : vector<256x128xf32>
      %c0_14 = arith.constant 0 : index
      %c0_15 = arith.constant 0 : index
      %16 = vector.load %arg5[%c0_14, %c0_15] : memref<1x128xf32, #tpu.memory_space<vmem>>, vector<1x128xf32>
      %17 = vector.broadcast %16 : vector<1x128xf32> to vector<256x128xf32>
      %18 = arith.addf %15, %17 : vector<256x128xf32>
      %c0_16 = arith.constant 0 : index
      %c0_17 = arith.constant 0 : index
      %19 = vector.load %arg6[%c0_16, %c0_17] : memref<256x128xf32, #tpu.memory_space<vmem>>, vector<256x128xf32>
      %20 = arith.addf %18, %19 : vector<256x128xf32>
      %cst_18 = arith.constant 0.000000e+00 : f32
      %21 = vector.broadcast %cst_18 : f32 to vector<256x128xf32>
      %22 = arith.maximumf %20, %21 : vector<256x128xf32>
      %c0_19 = arith.constant 0 : index
      %c0_20 = arith.constant 0 : index
      %23 = vector.load %arg7[%c0_19, %c0_20] : memref<256x128xf32, #tpu.memory_space<vmem>>, vector<256x128xf32>
      tpu.vector_store %arg7[%c0_19, %c0_20], %22 {strides = array<i32>} : memref<256x128xf32, #tpu.memory_space<vmem>>, vector<256x128xf32>,
    } else {
    }
    return
  }
  func.func @transform_0(%arg0: i32, %arg1: i32) -> (i32, i32) {
    %c0_i32 = arith.constant 0 : i32
    return %arg0, %arg1 : i32, i32
  }
  func.func @transform_1(%arg0: i32, %arg1: i32) -> (i32, i32) {
    %c0_i32 = arith.constant 0 : i32
    %c0_i32_0 = arith.constant 0 : i32
    return %arg1, %c0_i32 : i32, i32
  }
  func.func @transform_2(%arg0: i32, %arg1: i32) -> (i32, i32) {
    %c0_i32 = arith.constant 0 : i32
    %c0_i32_0 = arith.constant 0 : i32
    %c0_i32_1 = arith.constant 0 : i32
    return %c0_i32, %c0_i32_0 : i32, i32
  }
  func.func @transform_3(%arg0: i32, %arg1: i32) -> (i32, i32) {
    %c0_i32 = arith.constant 0 : i32
    %c0_i32_0 = arith.constant 0 : i32
    %c0_i32_1 = arith.constant 0 : i32
    return %c0_i32, %c0_i32_0 : i32, i32
  }
  func.func @transform_4(%arg0: i32, %arg1: i32) -> (i32, i32) {
    %c0_i32 = arith.constant 0 : i32
    %c0_i32_0 = arith.constant 0 : i32
    return %arg0, %c0_i32 : i32, i32
  }
  func.func @transform_5(%arg0: i32, %arg1: i32) -> (i32, i32) {
    %c0_i32 = arith.constant 0 : i32
    %c0_i32_0 = arith.constant 0 : i32
    return %arg0, %c0_i32 : i32, i32
  }
}

</mosaic_0001>

<bundles_post_ra>
// kernel: residual_block_forward.3
= control target key start
LH: loop header
LB: loop body
LE: loop exit
PB: predicated region body
PF: predicated region fallthrough
CT: control target
= control target key end

     0   :  { %s1215_s15 = smov 0   ;;  %s1217_s16 = smov 0   ;;  %s1402_s0 = inlined_call_operand.vmem [shape: bf16[512,128], index: 0, kind: input, shape index: {}]   ;;  %s1403_s1 = inlined_call_operand.vmem [shape: bf16[128,128], index: 1, kind: input, shape index: {}]   ;;  %s1404_s2 = inlined_call_operand.vmem [shape: f32[1,128], index: 2, kind: input, shape index: {}]   ;;  %s1405_s3 = inlined_call_operand.vmem [shape: f32[1,128], index: 3, kind: input, shape index: {}]   ;;  %s1406_s4 = inlined_call_operand.vmem [shape: f32[512,128], index: 4, kind: output, shape index: {}]  }
   0x1   :  { %s1219_s17 = smov 0  }
   0x2 LB: > { %s26_s18 = sadd.s32 1, %s1184_s16  ;;  %p997_p0 = scmp.ge.s32.totalorder %s1188_s17, 1  ;;  %s1188_s17 = sphi %s1219_s17, %s14_s17   ;;  %s1184_s16 = sphi %s1217_s16, %s1408_s16   ;;  %s1180_s15 = sphi %s1215_s15, %s1407_s15  }
   0x3   : > { %p28_p1 = scmp.ge.s32.totalorder %s26_s18, 2  ;;  %p191_p2 = scmp.lt.s32.totalorder %s1188_s17, 3 }
   0x5   : > { %s1410_s18 = smov (%p28_p1, %s26_s18), 0  ;;  %p192_p3 = pnand %p997_p0, %p191_p2 }
   0x6   : > { %s998_s21 = sshll.u32 (!%p192_p3), %s1180_s15, 5 }
   0x7   : > { %195 = sbr.rel (%p192_p3) target bundleno = 275 (0x113), region = 36  ;;  %p226_p4 = scmp.lt.s32.totalorder (!%p192_p3), %s998_s21, 63 }
   0xc   : > { %v1142_v0 = vld [vmem:[%s1403_s1 + $0x38] sm:$0xff]   ;;  %v1143_v1 = vld [vmem:[%s1403_s1 + $0x30] sm:$0xff]   ;;  %s1412_s21 = smov (!%p226_p4, %s998_s21), 63  ;;  %v1144_v2 = vld [vmem:[%s1403_s1 + $0x28] sm:$0xff]  }
   0xd   : > { %1054 = vmatprep.subr.bf16.mxu0 %v1142_v0  ;;  %1102 = vmatprep.subr.bf16.mxu1 %v1142_v0  ;;  %s999_s26 = sshll.u32 %s1412_s21, 2  ;;  %v1145_v3 = vld [vmem:[%s1403_s1 + $0x20] sm:$0xff]   ;;  %v1146_v6 = vld [vmem:[%s1403_s1 + $0x18] sm:$0xff]   ;;  %v1147_v7 = vld [vmem:[%s1403_s1 + $0x10] sm:$0xff]   ;;  %s1001_s22 = sshll.u32 %s1412_s21, 3 }
   0xe   : > { %1055 = vmatpush3.bf16.msra.mxu0 %v1142_v0  ;;  %1110 = vmatpush3.bf16.msra.mxu1 %v1142_v0  ;;  %s1248_s29 = scalar_lea.vmem %s1402_s0, %s999_s26  ;;  %v1148_v8 = vld [vmem:[%s1403_s1 + $0x8] sm:$0xff]   ;;  %v1149_v9 = vld [vmem:[%s1403_s1] sm:$0xff]   ;;  %s1301_s25 = scalar_lea.vmem %s1406_s4, %s1001_s22 }
   0xf   : > { %1056 = vmatprep.subr.bf16.mxu0 %v1143_v1  ;;  %1103 = vmatprep.subr.bf16.mxu1 %v1143_v1  ;;  %v1150_v4 = vld [vmem:[%s1248_s29] sm:$0xff]   ;;  %v1152_v10 = vld [vmem:[%s1248_s29 + $0x8] sm:$0xff]   ;;  %v1154_v12 = vld [vmem:[%s1248_s29 + $0x10] sm:$0xff]  }
  0x10   : > { %v1151_v5 = vld [vmem:[%s1248_s29 + $0x40] sm:$0xff]   ;;  %1070 = vmatprep.mubr.bf16.mxu0 %v1150_v4  ;;  %v1153_v11 = vld [vmem:[%s1248_s29 + $0x48] sm:$0xff]   ;;  %v1155_v13 = vld [vmem:[%s1248_s29 + $0x50] sm:$0xff]  }
  0x11   : > { %1086 = vmatprep.mubr.bf16.mxu1 %v1151_v5  ;;  %v1156_v14 = vld [vmem:[%s1248_s29 + $0x18] sm:$0xff]   ;;  %v1158_v16 = vld [vmem:[%s1248_s29 + $0x20] sm:$0xff]   ;;  %v1160_v18 = vld [vmem:[%s1248_s29 + $0x28] sm:$0xff]  }
  0x12   : > { %1057 = vmatpush3.bf16.msra.mxu0 %v1143_v1  ;;  %1111 = vmatpush3.bf16.msra.mxu1 %v1143_v1  ;;  %v1157_v15 = vld [vmem:[%s1248_s29 + $0x58] sm:$0xff]   ;;  %v1159_v17 = vld [vmem:[%s1248_s29 + $0x60] sm:$0xff]   ;;  %v1161_v19 = vld [vmem:[%s1248_s29 + $0x68] sm:$0xff]  }
  0x13   : > { %1058 = vmatprep.subr.bf16.mxu0 %v1144_v2  ;;  %1104 = vmatprep.subr.bf16.mxu1 %v1144_v2  ;;  %v1162_v20 = vld [vmem:[%s1248_s29 + $0x30] sm:$0xff]   ;;  %v1164_v22 = vld [vmem:[%s1248_s29 + $0x38] sm:$0xff]   ;;  %v1284_v24 = vld [vmem:[%s1404_s2] ss:$0 sm:$0xff] }
  0x14   : > { %v1163_v21 = vld [vmem:[%s1248_s29 + $0x70] sm:$0xff]   ;;  %v1165_v23 = vld [vmem:[%s1248_s29 + $0x78] sm:$0xff]   ;;  %v1289_v26 = vld [vmem:[%s1405_s3] ss:$0 sm:$0xff] }
  0x16   : > { %1059 = vmatpush3.bf16.msra.mxu0 %v1144_v2  ;;  %1112 = vmatpush3.bf16.msra.mxu1 %v1144_v2 }
  0x17   : > { %1060 = vmatprep.subr.bf16.mxu0 %v1145_v3  ;;  %1105 = vmatprep.subr.bf16.mxu1 %v1145_v3 }
  0x1a   : > { %1061 = vmatpush3.bf16.msra.mxu0 %v1145_v3  ;;  %1113 = vmatpush3.bf16.msra.mxu1 %v1145_v3 }
  0x1b   : > { %1062 = vmatprep.subr.bf16.mxu0 %v1146_v6  ;;  %1106 = vmatprep.subr.bf16.mxu1 %v1146_v6 }
  0x1e   : > { %1063 = vmatpush3.bf16.msra.mxu0 %v1146_v6  ;;  %1114 = vmatpush3.bf16.msra.mxu1 %v1146_v6 }
  0x1f   : > { %1064 = vmatprep.subr.bf16.mxu0 %v1147_v7  ;;  %1107 = vmatprep.subr.bf16.mxu1 %v1147_v7 }
  0x22   : > { %1065 = vmatpush3.bf16.msra.mxu0 %v1147_v7  ;;  %1115 = vmatpush3.bf16.msra.mxu1 %v1147_v7 }
  0x23   : > { %1066 = vmatprep.subr.bf16.mxu0 %v1148_v8  ;;  %1108 = vmatprep.subr.bf16.mxu1 %v1148_v8 }
  0x26   : > { %1067 = vmatpush3.bf16.msra.mxu0 %v1148_v8  ;;  %1116 = vmatpush3.bf16.msra.mxu1 %v1148_v8 }
  0x27   : > { %1068 = vmatprep.subr.bf16.mxu0 %v1149_v9  ;;  %1109 = vmatprep.subr.bf16.mxu1 %v1149_v9 }
  0x2a   : > { %1069 = vmatpush3.bf16.msra.mxu0 %v1149_v9  ;;  %1117 = vmatpush3.bf16.msra.mxu1 %v1149_v9 }
  0x2d   : > { %1071 = vmatmul.mubr.bf16.vlgmr.msra.gmra.mxu0 %v1152_v10  ;;  %1087 = vmatmul.mubr.bf16.vlgmr.msra.gmra.mxu1 %v1153_v11 }
  0x2e   : > { %1074 = vmatprep.mubr.bf16.mxu0 %v1154_v12  ;;  %1090 = vmatprep.mubr.bf16.mxu1 %v1155_v13 }
  0x35   : > { %1075 = vmatmul.mubr.bf16.gmra.mxu0 %v1156_v14  ;;  %1091 = vmatmul.mubr.bf16.gmra.mxu1 %v1157_v15 }
  0x36   : > { %1078 = vmatprep.mubr.bf16.mxu0 %v1158_v16  ;;  %1094 = vmatprep.mubr.bf16.mxu1 %v1159_v17 }
  0x3d   : > { %1079 = vmatmul.mubr.bf16.gmra.mxu0 %v1160_v18  ;;  %1095 = vmatmul.mubr.bf16.gmra.mxu1 %v1161_v19 }
  0x3e   : > { %1082 = vmatprep.mubr.bf16.mxu0 %v1162_v20  ;;  %1098 = vmatprep.mubr.bf16.mxu1 %v1163_v21 }
  0x45   : > { %1083 = vmatmul.mubr.bf16.gmra.mxu0 %v1164_v22  ;;  %1099 = vmatmul.mubr.bf16.gmra.mxu1 %v1165_v23 }
  0xed   : > { %v1072_v25 = vpop.f32.mrf.mxu0  ;;  %v1088_v27 = vpop.f32.mrf.mxu1 }
  0xee   : > { %v776_v28 = vmul.f32 %v1072_v25, %v1284_v24  ;;  %v792_v29 = vmul.f32 %v1088_v27, %v1284_v24 }
  0xef   : > { %v541_v30 = vpop.f32.mrf.mxu0  ;;  %v605_v31 = vpop.f32.mrf.mxu1 }
  0xf0   : > { %v815_v32 = vadd.f32 %v1289_v26, %v776_v28  ;;  %v831_v33 = vadd.f32 %v1289_v26, %v792_v29  ;;  %v774_v34 = vmul.f32 %v1284_v24, %v541_v30  ;;  %v790_v35 = vmul.f32 %v1284_v24, %v605_v31 }
  0xf1   : > { %v1073_v36 = vpop.f32.mrf.mxu0  ;;  %v1089_v37 = vpop.f32.mrf.mxu1 }
  0xf2   : > { %v847_v38 = vmax.f32 %v815_v32, 0.0  ;;  %v863_v39 = vmax.f32 %v831_v33, 0.0  ;;  %v813_v40 = vadd.f32 %v1289_v26, %v774_v34  ;;  %v829_v41 = vadd.f32 %v1289_v26, %v790_v35 }
  0xf3   : > { %v777_v42 = vmul.f32 %v1073_v36, %v1284_v24  ;;  %v793_v43 = vmul.f32 %v1089_v37, %v1284_v24  ;;  %v544_v44 = vpop.f32.mrf.mxu0  ;;  %v608_v45 = vpop.f32.mrf.mxu1 }
  0xf4   : > { %879 = vst [vmem:[%s1301_s25 + $0x10] sm:$0xff] %v847_v38  ;;  %895 = vst [vmem:[%s1301_s25 + $0x90] sm:$0xff] %v863_v39  ;;  %v845_v46 = vmax.f32 %v813_v40, 0.0  ;;  %v861_v47 = vmax.f32 %v829_v41, 0.0  ;;  %v775_v48 = vmul.f32 %v1284_v24, %v544_v44  ;;  %v791_v49 = vmul.f32 %v1284_v24, %v608_v45 }
  0xf5   : > { %v816_v50 = vadd.f32 %v1289_v26, %v777_v42  ;;  %v832_v51 = vadd.f32 %v1289_v26, %v793_v43  ;;  %v1076_v52 = vpop.f32.mrf.mxu0  ;;  %v1092_v53 = vpop.f32.mrf.mxu1 }
  0xf6   : > { %877 = vst [vmem:[%s1301_s25] sm:$0xff] %v845_v46  ;;  %893 = vst [vmem:[%s1301_s25 + $0x80] sm:$0xff] %v861_v47  ;;  %v814_v54 = vadd.f32 %v1289_v26, %v775_v48  ;;  %v830_v55 = vadd.f32 %v1289_v26, %v791_v49  ;;  %v780_v56 = vmul.f32 %v1076_v52, %v1284_v24 }
  0xf7   : > { %v796_v57 = vmul.f32 %v1092_v53, %v1284_v24  ;;  %v848_v58 = vmax.f32 %v816_v50, 0.0  ;;  %v864_v59 = vmax.f32 %v832_v51, 0.0  ;;  %v557_v60 = vpop.f32.mrf.mxu0  ;;  %v621_v61 = vpop.f32.mrf.mxu1 }
  0xf8   : > { %v846_v62 = vmax.f32 %v814_v54, 0.0  ;;  %v862_v63 = vmax.f32 %v830_v55, 0.0  ;;  %v819_v0 = vadd.f32 %v1289_v26, %v780_v56  ;;  %v778_v2 = vmul.f32 %v1284_v24, %v557_v60 }
  0xf9   : > { %v835_v1 = vadd.f32 %v1289_v26, %v796_v57  ;;  %880 = vst [vmem:[%s1301_s25 + $0x18] sm:$0xff] %v848_v58  ;;  %896 = vst [vmem:[%s1301_s25 + $0x98] sm:$0xff] %v864_v59  ;;  %v794_v3 = vmul.f32 %v1284_v24, %v621_v61  ;;  %v1077_v4 = vpop.f32.mrf.mxu0  ;;  %v1093_v5 = vpop.f32.mrf.mxu1 }
  0xfa   : > { %878 = vst [vmem:[%s1301_s25 + $0x8] sm:$0xff] %v846_v62  ;;  %894 = vst [vmem:[%s1301_s25 + $0x88] sm:$0xff] %v862_v63  ;;  %v851_v6 = vmax.f32 %v819_v0, 0.0  ;;  %v781_v8 = vmul.f32 %v1077_v4, %v1284_v24  ;;  %v797_v9 = vmul.f32 %v1093_v5, %v1284_v24  ;;  %v817_v10 = vadd.f32 %v1289_v26, %v778_v2 }
  0xfb   : > { %v867_v7 = vmax.f32 %v835_v1, 0.0  ;;  %v833_v11 = vadd.f32 %v1289_v26, %v794_v3  ;;  %v560_v12 = vpop.f32.mrf.mxu0  ;;  %v624_v13 = vpop.f32.mrf.mxu1 }
  0xfc   : > { %883 = vst [vmem:[%s1301_s25 + $0x30] sm:$0xff] %v851_v6  ;;  %v820_v14 = vadd.f32 %v1289_v26, %v781_v8  ;;  %v836_v15 = vadd.f32 %v1289_v26, %v797_v9  ;;  %v779_v16 = vmul.f32 %v1284_v24, %v560_v12  ;;  %v795_v17 = vmul.f32 %v1284_v24, %v624_v13 }
  0xfd   : > { %899 = vst [vmem:[%s1301_s25 + $0xb0] sm:$0xff] %v867_v7  ;;  %v849_v18 = vmax.f32 %v817_v10, 0.0  ;;  %v865_v19 = vmax.f32 %v833_v11, 0.0  ;;  %v1080_v20 = vpop.f32.mrf.mxu0  ;;  %v1096_v21 = vpop.f32.mrf.mxu1 }
  0xfe   : > { %v852_v22 = vmax.f32 %v820_v14, 0.0  ;;  %v868_v23 = vmax.f32 %v836_v15, 0.0  ;;  %v818_v25 = vadd.f32 %v1289_v26, %v779_v16  ;;  %v834_v27 = vadd.f32 %v1289_v26, %v795_v17 }
  0xff   : > { %881 = vst [vmem:[%s1301_s25 + $0x20] sm:$0xff] %v849_v18  ;;  %897 = vst [vmem:[%s1301_s25 + $0xa0] sm:$0xff] %v865_v19  ;;  %v784_v28 = vmul.f32 %v1080_v20, %v1284_v24  ;;  %v800_v29 = vmul.f32 %v1096_v21, %v1284_v24  ;;  %v573_v30 = vpop.f32.mrf.mxu0  ;;  %v637_v31 = vpop.f32.mrf.mxu1 }
 0x100   : > { %884 = vst [vmem:[%s1301_s25 + $0x38] sm:$0xff] %v852_v22  ;;  %900 = vst [vmem:[%s1301_s25 + $0xb8] sm:$0xff] %v868_v23  ;;  %v850_v32 = vmax.f32 %v818_v25, 0.0  ;;  %v866_v33 = vmax.f32 %v834_v27, 0.0  ;;  %v782_v34 = vmul.f32 %v1284_v24, %v573_v30  ;;  %v798_v35 = vmul.f32 %v1284_v24, %v637_v31 }
 0x101   : > { %v823_v36 = vadd.f32 %v1289_v26, %v784_v28  ;;  %v839_v37 = vadd.f32 %v1289_v26, %v800_v29  ;;  %v1081_v38 = vpop.f32.mrf.mxu0  ;;  %v1097_v39 = vpop.f32.mrf.mxu1 }
 0x102   : > { %882 = vst [vmem:[%s1301_s25 + $0x28] sm:$0xff] %v850_v32  ;;  %898 = vst [vmem:[%s1301_s25 + $0xa8] sm:$0xff] %v866_v33  ;;  %v821_v40 = vadd.f32 %v1289_v26, %v782_v34  ;;  %v837_v41 = vadd.f32 %v1289_v26, %v798_v35  ;;  %v785_v42 = vmul.f32 %v1081_v38, %v1284_v24 }
 0x103   : > { %v801_v43 = vmul.f32 %v1097_v39, %v1284_v24  ;;  %v855_v44 = vmax.f32 %v823_v36, 0.0  ;;  %v871_v45 = vmax.f32 %v839_v37, 0.0  ;;  %v576_v46 = vpop.f32.mrf.mxu0  ;;  %v640_v47 = vpop.f32.mrf.mxu1 }
 0x104   : > { %v853_v48 = vmax.f32 %v821_v40, 0.0  ;;  %v869_v49 = vmax.f32 %v837_v41, 0.0  ;;  %v824_v50 = vadd.f32 %v1289_v26, %v785_v42  ;;  %v783_v52 = vmul.f32 %v1284_v24, %v576_v46 }
 0x105   : > { %v840_v51 = vadd.f32 %v1289_v26, %v801_v43  ;;  %887 = vst [vmem:[%s1301_s25 + $0x50] sm:$0xff] %v855_v44  ;;  %903 = vst [vmem:[%s1301_s25 + $0xd0] sm:$0xff] %v871_v45  ;;  %v799_v53 = vmul.f32 %v1284_v24, %v640_v47  ;;  %v1084_v54 = vpop.f32.mrf.mxu0  ;;  %v1100_v55 = vpop.f32.mrf.mxu1 }
 0x106   : > { %885 = vst [vmem:[%s1301_s25 + $0x40] sm:$0xff] %v853_v48  ;;  %901 = vst [vmem:[%s1301_s25 + $0xc0] sm:$0xff] %v869_v49  ;;  %v856_v56 = vmax.f32 %v824_v50, 0.0  ;;  %v788_v58 = vmul.f32 %v1084_v54, %v1284_v24  ;;  %v804_v59 = vmul.f32 %v1100_v55, %v1284_v24  ;;  %v822_v60 = vadd.f32 %v1289_v26, %v783_v52 }
 0x107   : > { %v872_v57 = vmax.f32 %v840_v51, 0.0  ;;  %v838_v61 = vadd.f32 %v1289_v26, %v799_v53  ;;  %v589_v62 = vpop.f32.mrf.mxu0  ;;  %v653_v63 = vpop.f32.mrf.mxu1 }
 0x108   : > { %888 = vst [vmem:[%s1301_s25 + $0x58] sm:$0xff] %v856_v56  ;;  %v827_v0 = vadd.f32 %v1289_v26, %v788_v58  ;;  %v843_v1 = vadd.f32 %v1289_v26, %v804_v59  ;;  %v786_v2 = vmul.f32 %v1284_v24, %v589_v62  ;;  %v802_v3 = vmul.f32 %v1284_v24, %v653_v63 }
 0x109   : > { %904 = vst [vmem:[%s1301_s25 + $0xd8] sm:$0xff] %v872_v57  ;;  %v854_v4 = vmax.f32 %v822_v60, 0.0  ;;  %v870_v5 = vmax.f32 %v838_v61, 0.0  ;;  %v1085_v6 = vpop.f32.mrf.mxu0  ;;  %v1101_v7 = vpop.f32.mrf.mxu1 }
 0x10a   : > { %v859_v8 = vmax.f32 %v827_v0, 0.0  ;;  %v875_v9 = vmax.f32 %v843_v1, 0.0  ;;  %v825_v10 = vadd.f32 %v1289_v26, %v786_v2  ;;  %v841_v11 = vadd.f32 %v1289_v26, %v802_v3 }
 0x10b   : > { %886 = vst [vmem:[%s1301_s25 + $0x48] sm:$0xff] %v854_v4  ;;  %902 = vst [vmem:[%s1301_s25 + $0xc8] sm:$0xff] %v870_v5  ;;  %v789_v12 = vmul.f32 %v1085_v6, %v1284_v24  ;;  %v805_v13 = vmul.f32 %v1101_v7, %v1284_v24  ;;  %v592_v14 = vpop.f32.mrf.mxu0  ;;  %v656_v15 = vpop.f32.mrf.mxu1 }
 0x10c   : > { %891 = vst [vmem:[%s1301_s25 + $0x70] sm:$0xff] %v859_v8  ;;  %907 = vst [vmem:[%s1301_s25 + $0xf0] sm:$0xff] %v875_v9  ;;  %v857_v16 = vmax.f32 %v825_v10, 0.0  ;;  %v873_v17 = vmax.f32 %v841_v11, 0.0  ;;  %v787_v18 = vmul.f32 %v1284_v24, %v592_v14  ;;  %v803_v19 = vmul.f32 %v1284_v24, %v656_v15 }
 0x10d   : > { %v828_v20 = vadd.f32 %v1289_v26, %v789_v12  ;;  %v844_v21 = vadd.f32 %v1289_v26, %v805_v13 }
 0x10e   : > { %889 = vst [vmem:[%s1301_s25 + $0x60] sm:$0xff] %v857_v16  ;;  %905 = vst [vmem:[%s1301_s25 + $0xe0] sm:$0xff] %v873_v17  ;;  %v826_v22 = vadd.f32 %v1289_v26, %v787_v18  ;;  %v842_v23 = vadd.f32 %v1289_v26, %v803_v19 }
 0x10f   : > { %v860_v25 = vmax.f32 %v828_v20, 0.0  ;;  %v876_v27 = vmax.f32 %v844_v21, 0.0 }
 0x110   : > { %v858_v28 = vmax.f32 %v826_v22, 0.0  ;;  %v874_v29 = vmax.f32 %v842_v23, 0.0 }
 0x111   : > { %892 = vst [vmem:[%s1301_s25 + $0x78] sm:$0xff] %v860_v25  ;;  %908 = vst [vmem:[%s1301_s25 + $0xf8] sm:$0xff] %v876_v27 }
 0x112   : > { %890 = vst [vmem:[%s1301_s25 + $0x68] sm:$0xff] %v858_v28  ;;  %906 = vst [vmem:[%s1301_s25 + $0xe8] sm:$0xff] %v874_v29 }
 0x113 PF: > { %s14_s17 = sadd.s32 1, %s1188_s17   ;;  %s1407_s15 = smov %s1184_s16 }
 0x114   : > { %p11_p5 = scmp.ge.s32.totalorder %s14_s17, 4   ;;  %s1408_s16 = smov %s1410_s18 }
 0x116   :  { %13 = sbr.rel (!%p11_p5) target bundleno = 2 (0x2), region = 77 }

// kernel: residual_block_forward.4
= control target key start
LH: loop header
LB: loop body
LE: loop exit
PB: predicated region body
PF: predicated region fallthrough
CT: control target
= control target key end

     0   :  { %s1183_s15 = smov 0   ;;  %s1185_s16 = smov 0   ;;  %s1370_s0 = inlined_call_operand.vmem [shape: bf16[512,128], index: 0, kind: input, shape index: {}]   ;;  %s1371_s1 = inlined_call_operand.vmem [shape: bf16[128,128], index: 1, kind: input, shape index: {}]   ;;  %s1372_s2 = inlined_call_operand.vmem [shape: f32[1,128], index: 2, kind: input, shape index: {}]   ;;  %s1373_s3 = inlined_call_operand.vmem [shape: f32[1,128], index: 3, kind: input, shape index: {}]   ;;  %s1374_s4 = inlined_call_operand.vmem [shape: f32[512,128], index: 4, kind: output, shape index: {}]  }
   0x1   :  { %s1187_s17 = smov 0  }
   0x2 LB: > { %s26_s18 = sadd.s32 1, %s1152_s16  ;;  %p965_p0 = scmp.ge.s32.totalorder %s1156_s17, 1  ;;  %s1156_s17 = sphi %s1187_s17, %s14_s17   ;;  %s1152_s16 = sphi %s1185_s16, %s1376_s16   ;;  %s1148_s15 = sphi %s1183_s15, %s1375_s15  }
   0x3   : > { %p28_p1 = scmp.ge.s32.totalorder %s26_s18, 2  ;;  %p191_p2 = scmp.lt.s32.totalorder %s1156_s17, 3 }
   0x5   : > { %s1378_s18 = smov (%p28_p1, %s26_s18), 0  ;;  %p192_p3 = pnand %p965_p0, %p191_p2 }
   0x6   : > { %s966_s21 = sshll.u32 (!%p192_p3), %s1148_s15, 5 }
   0x7   : > { %195 = sbr.rel (%p192_p3) target bundleno = 273 (0x111), region = 36  ;;  %p226_p4 = scmp.lt.s32.totalorder (!%p192_p3), %s966_s21, 63 }
   0xc   : > { %v1110_v0 = vld [vmem:[%s1371_s1 + $0x38] sm:$0xff]   ;;  %v1111_v1 = vld [vmem:[%s1371_s1 + $0x30] sm:$0xff]   ;;  %s1380_s21 = smov (!%p226_p4, %s966_s21), 63  ;;  %v1112_v2 = vld [vmem:[%s1371_s1 + $0x28] sm:$0xff]  }
   0xd   : > { %1022 = vmatprep.subr.bf16.mxu0 %v1110_v0  ;;  %1070 = vmatprep.subr.bf16.mxu1 %v1110_v0  ;;  %s967_s26 = sshll.u32 %s1380_s21, 2  ;;  %v1113_v3 = vld [vmem:[%s1371_s1 + $0x20] sm:$0xff]   ;;  %v1114_v6 = vld [vmem:[%s1371_s1 + $0x18] sm:$0xff]   ;;  %v1115_v7 = vld [vmem:[%s1371_s1 + $0x10] sm:$0xff]   ;;  %s969_s19 = sshll.u32 %s1380_s21, 3 }
   0xe   : > { %1023 = vmatpush3.bf16.msra.mxu0 %v1110_v0  ;;  %1078 = vmatpush3.bf16.msra.mxu1 %v1110_v0  ;;  %s1216_s29 = scalar_lea.vmem %s1370_s0, %s967_s26  ;;  %v1116_v8 = vld [vmem:[%s1371_s1 + $0x8] sm:$0xff]   ;;  %v1117_v9 = vld [vmem:[%s1371_s1] sm:$0xff]   ;;  %s1265_s25 = scalar_lea.vmem %s1374_s4, %s969_s19 }
   0xf   : > { %1024 = vmatprep.subr.bf16.mxu0 %v1111_v1  ;;  %1071 = vmatprep.subr.bf16.mxu1 %v1111_v1  ;;  %v1118_v4 = vld [vmem:[%s1216_s29] sm:$0xff]   ;;  %v1120_v10 = vld [vmem:[%s1216_s29 + $0x8] sm:$0xff]   ;;  %v1122_v12 = vld [vmem:[%s1216_s29 + $0x10] sm:$0xff]  }
  0x10   : > { %v1119_v5 = vld [vmem:[%s1216_s29 + $0x40] sm:$0xff]   ;;  %1038 = vmatprep.mubr.bf16.mxu0 %v1118_v4  ;;  %v1121_v11 = vld [vmem:[%s1216_s29 + $0x48] sm:$0xff]   ;;  %v1123_v13 = vld [vmem:[%s1216_s29 + $0x50] sm:$0xff]  }
  0x11   : > { %1054 = vmatprep.mubr.bf16.mxu1 %v1119_v5  ;;  %v1124_v14 = vld [vmem:[%s1216_s29 + $0x18] sm:$0xff]   ;;  %v1126_v16 = vld [vmem:[%s1216_s29 + $0x20] sm:$0xff]   ;;  %v1128_v18 = vld [vmem:[%s1216_s29 + $0x28] sm:$0xff]  }
  0x12   : > { %1025 = vmatpush3.bf16.msra.mxu0 %v1111_v1  ;;  %1079 = vmatpush3.bf16.msra.mxu1 %v1111_v1  ;;  %v1125_v15 = vld [vmem:[%s1216_s29 + $0x58] sm:$0xff]   ;;  %v1127_v17 = vld [vmem:[%s1216_s29 + $0x60] sm:$0xff]   ;;  %v1129_v19 = vld [vmem:[%s1216_s29 + $0x68] sm:$0xff]  }
  0x13   : > { %1026 = vmatprep.subr.bf16.mxu0 %v1112_v2  ;;  %1072 = vmatprep.subr.bf16.mxu1 %v1112_v2  ;;  %v1130_v20 = vld [vmem:[%s1216_s29 + $0x30] sm:$0xff]   ;;  %v1132_v22 = vld [vmem:[%s1216_s29 + $0x38] sm:$0xff]   ;;  %v1252_v24 = vld [vmem:[%s1372_s2] ss:$0 sm:$0xff] }
  0x14   : > { %v1131_v21 = vld [vmem:[%s1216_s29 + $0x70] sm:$0xff]   ;;  %v1133_v23 = vld [vmem:[%s1216_s29 + $0x78] sm:$0xff]   ;;  %v1258_v26 = vld [vmem:[%s1373_s3] ss:$0 sm:$0xff] }
  0x16   : > { %1027 = vmatpush3.bf16.msra.mxu0 %v1112_v2  ;;  %1080 = vmatpush3.bf16.msra.mxu1 %v1112_v2 }
  0x17   : > { %1028 = vmatprep.subr.bf16.mxu0 %v1113_v3  ;;  %1073 = vmatprep.subr.bf16.mxu1 %v1113_v3 }
  0x1a   : > { %1029 = vmatpush3.bf16.msra.mxu0 %v1113_v3  ;;  %1081 = vmatpush3.bf16.msra.mxu1 %v1113_v3 }
  0x1b   : > { %1030 = vmatprep.subr.bf16.mxu0 %v1114_v6  ;;  %1074 = vmatprep.subr.bf16.mxu1 %v1114_v6 }
  0x1e   : > { %1031 = vmatpush3.bf16.msra.mxu0 %v1114_v6  ;;  %1082 = vmatpush3.bf16.msra.mxu1 %v1114_v6 }
  0x1f   : > { %1032 = vmatprep.subr.bf16.mxu0 %v1115_v7  ;;  %1075 = vmatprep.subr.bf16.mxu1 %v1115_v7 }
  0x22   : > { %1033 = vmatpush3.bf16.msra.mxu0 %v1115_v7  ;;  %1083 = vmatpush3.bf16.msra.mxu1 %v1115_v7 }
  0x23   : > { %1034 = vmatprep.subr.bf16.mxu0 %v1116_v8  ;;  %1076 = vmatprep.subr.bf16.mxu1 %v1116_v8 }
  0x26   : > { %1035 = vmatpush3.bf16.msra.mxu0 %v1116_v8  ;;  %1084 = vmatpush3.bf16.msra.mxu1 %v1116_v8 }
  0x27   : > { %1036 = vmatprep.subr.bf16.mxu0 %v1117_v9  ;;  %1077 = vmatprep.subr.bf16.mxu1 %v1117_v9 }
  0x2a   : > { %1037 = vmatpush3.bf16.msra.mxu0 %v1117_v9  ;;  %1085 = vmatpush3.bf16.msra.mxu1 %v1117_v9 }
  0x2d   : > { %1039 = vmatmul.mubr.bf16.vlgmr.msra.gmra.mxu0 %v1120_v10  ;;  %1055 = vmatmul.mubr.bf16.vlgmr.msra.gmra.mxu1 %v1121_v11 }
  0x2e   : > { %1042 = vmatprep.mubr.bf16.mxu0 %v1122_v12  ;;  %1058 = vmatprep.mubr.bf16.mxu1 %v1123_v13 }
  0x35   : > { %1043 = vmatmul.mubr.bf16.gmra.mxu0 %v1124_v14  ;;  %1059 = vmatmul.mubr.bf16.gmra.mxu1 %v1125_v15 }
  0x36   : > { %1046 = vmatprep.mubr.bf16.mxu0 %v1126_v16  ;;  %1062 = vmatprep.mubr.bf16.mxu1 %v1127_v17 }
  0x3d   : > { %1047 = vmatmul.mubr.bf16.gmra.mxu0 %v1128_v18  ;;  %1063 = vmatmul.mubr.bf16.gmra.mxu1 %v1129_v19 }
  0x3e   : > { %1050 = vmatprep.mubr.bf16.mxu0 %v1130_v20  ;;  %1066 = vmatprep.mubr.bf16.mxu1 %v1131_v21 }
  0x45   : > { %1051 = vmatmul.mubr.bf16.gmra.mxu0 %v1132_v22  ;;  %1067 = vmatmul.mubr.bf16.gmra.mxu1 %v1133_v23 }
  0xed   : > { %v1040_v25 = vpop.f32.mrf.mxu0  ;;  %v1056_v27 = vpop.f32.mrf.mxu1 }
  0xee   : > { %v776_v28 = vmul.f32 %v1040_v25, %v1252_v24  ;;  %v792_v29 = vmul.f32 %v1056_v27, %v1252_v24 }
  0xef   : > { %v541_v30 = vpop.f32.mrf.mxu0  ;;  %v605_v31 = vpop.f32.mrf.mxu1 }
  0xf0   : > { %v815_v32 = vadd.f32 %v1258_v26, %v776_v28  ;;  %v831_v33 = vadd.f32 %v1258_v26, %v792_v29  ;;  %v774_v34 = vmul.f32 %v1252_v24, %v541_v30  ;;  %v790_v35 = vmul.f32 %v1252_v24, %v605_v31 }
  0xf1   : > { %v1041_v36 = vpop.f32.mrf.mxu0  ;;  %v1057_v37 = vpop.f32.mrf.mxu1 }
  0xf2   : > { %847 = vst [vmem:[%s1265_s25 + $0x10] sm:$0xff] %v815_v32  ;;  %863 = vst [vmem:[%s1265_s25 + $0x90] sm:$0xff] %v831_v33  ;;  %v813_v38 = vadd.f32 %v1258_v26, %v774_v34  ;;  %v829_v39 = vadd.f32 %v1258_v26, %v790_v35  ;;  %v777_v40 = vmul.f32 %v1041_v36, %v1252_v24 }
  0xf3   : > { %v793_v41 = vmul.f32 %v1057_v37, %v1252_v24  ;;  %v544_v42 = vpop.f32.mrf.mxu0  ;;  %v608_v43 = vpop.f32.mrf.mxu1 }
  0xf4   : > { %845 = vst [vmem:[%s1265_s25] sm:$0xff] %v813_v38  ;;  %861 = vst [vmem:[%s1265_s25 + $0x80] sm:$0xff] %v829_v39  ;;  %v816_v44 = vadd.f32 %v1258_v26, %v777_v40  ;;  %v775_v46 = vmul.f32 %v1252_v24, %v544_v42  ;;  %v791_v47 = vmul.f32 %v1252_v24, %v608_v43 }
  0xf5   : > { %v832_v45 = vadd.f32 %v1258_v26, %v793_v41  ;;  %v1044_v48 = vpop.f32.mrf.mxu0  ;;  %v1060_v49 = vpop.f32.mrf.mxu1 }
  0xf6   : > { %848 = vst [vmem:[%s1265_s25 + $0x18] sm:$0xff] %v816_v44  ;;  %v814_v50 = vadd.f32 %v1258_v26, %v775_v46  ;;  %v830_v51 = vadd.f32 %v1258_v26, %v791_v47  ;;  %v780_v52 = vmul.f32 %v1044_v48, %v1252_v24  ;;  %v796_v53 = vmul.f32 %v1060_v49, %v1252_v24 }
  0xf7   : > { %864 = vst [vmem:[%s1265_s25 + $0x98] sm:$0xff] %v832_v45  ;;  %v557_v54 = vpop.f32.mrf.mxu0  ;;  %v621_v55 = vpop.f32.mrf.mxu1 }
  0xf8   : > { %846 = vst [vmem:[%s1265_s25 + $0x8] sm:$0xff] %v814_v50  ;;  %862 = vst [vmem:[%s1265_s25 + $0x88] sm:$0xff] %v830_v51  ;;  %v819_v56 = vadd.f32 %v1258_v26, %v780_v52  ;;  %v835_v57 = vadd.f32 %v1258_v26, %v796_v53  ;;  %v778_v58 = vmul.f32 %v1252_v24, %v557_v54 }
  0xf9   : > { %v794_v59 = vmul.f32 %v1252_v24, %v621_v55  ;;  %v1045_v60 = vpop.f32.mrf.mxu0  ;;  %v1061_v61 = vpop.f32.mrf.mxu1 }
  0xfa   : > { %851 = vst [vmem:[%s1265_s25 + $0x30] sm:$0xff] %v819_v56  ;;  %867 = vst [vmem:[%s1265_s25 + $0xb0] sm:$0xff] %v835_v57  ;;  %v817_v62 = vadd.f32 %v1258_v26, %v778_v58  ;;  %v781_v0 = vmul.f32 %v1045_v60, %v1252_v24  ;;  %v797_v1 = vmul.f32 %v1061_v61, %v1252_v24 }
  0xfb   : > { %v833_v63 = vadd.f32 %v1258_v26, %v794_v59  ;;  %v560_v2 = vpop.f32.mrf.mxu0  ;;  %v624_v3 = vpop.f32.mrf.mxu1 }
  0xfc   : > { %849 = vst [vmem:[%s1265_s25 + $0x20] sm:$0xff] %v817_v62  ;;  %v820_v4 = vadd.f32 %v1258_v26, %v781_v0  ;;  %v836_v5 = vadd.f32 %v1258_v26, %v797_v1  ;;  %v779_v6 = vmul.f32 %v1252_v24, %v560_v2  ;;  %v795_v7 = vmul.f32 %v1252_v24, %v624_v3 }
  0xfd   : > { %865 = vst [vmem:[%s1265_s25 + $0xa0] sm:$0xff] %v833_v63  ;;  %v1048_v8 = vpop.f32.mrf.mxu0  ;;  %v1064_v9 = vpop.f32.mrf.mxu1 }
  0xfe   : > { %852 = vst [vmem:[%s1265_s25 + $0x38] sm:$0xff] %v820_v4  ;;  %868 = vst [vmem:[%s1265_s25 + $0xb8] sm:$0xff] %v836_v5  ;;  %v818_v10 = vadd.f32 %v1258_v26, %v779_v6  ;;  %v834_v11 = vadd.f32 %v1258_v26, %v795_v7  ;;  %v784_v12 = vmul.f32 %v1048_v8, %v1252_v24 }
  0xff   : > { %v800_v13 = vmul.f32 %v1064_v9, %v1252_v24  ;;  %v573_v14 = vpop.f32.mrf.mxu0  ;;  %v637_v15 = vpop.f32.mrf.mxu1 }
 0x100   : > { %850 = vst [vmem:[%s1265_s25 + $0x28] sm:$0xff] %v818_v10  ;;  %866 = vst [vmem:[%s1265_s25 + $0xa8] sm:$0xff] %v834_v11  ;;  %v823_v16 = vadd.f32 %v1258_v26, %v784_v12  ;;  %v782_v18 = vmul.f32 %v1252_v24, %v573_v14  ;;  %v798_v19 = vmul.f32 %v1252_v24, %v637_v15 }
 0x101   : > { %v839_v17 = vadd.f32 %v1258_v26, %v800_v13  ;;  %v1049_v20 = vpop.f32.mrf.mxu0  ;;  %v1065_v21 = vpop.f32.mrf.mxu1 }
 0x102   : > { %855 = vst [vmem:[%s1265_s25 + $0x50] sm:$0xff] %v823_v16  ;;  %v821_v22 = vadd.f32 %v1258_v26, %v782_v18  ;;  %v837_v23 = vadd.f32 %v1258_v26, %v798_v19  ;;  %v785_v25 = vmul.f32 %v1049_v20, %v1252_v24  ;;  %v801_v27 = vmul.f32 %v1065_v21, %v1252_v24 }
 0x103   : > { %871 = vst [vmem:[%s1265_s25 + $0xd0] sm:$0xff] %v839_v17  ;;  %v576_v28 = vpop.f32.mrf.mxu0  ;;  %v640_v29 = vpop.f32.mrf.mxu1 }
 0x104   : > { %853 = vst [vmem:[%s1265_s25 + $0x40] sm:$0xff] %v821_v22  ;;  %869 = vst [vmem:[%s1265_s25 + $0xc0] sm:$0xff] %v837_v23  ;;  %v824_v30 = vadd.f32 %v1258_v26, %v785_v25  ;;  %v840_v31 = vadd.f32 %v1258_v26, %v801_v27  ;;  %v783_v32 = vmul.f32 %v1252_v24, %v576_v28 }
 0x105   : > { %v799_v33 = vmul.f32 %v1252_v24, %v640_v29  ;;  %v1052_v34 = vpop.f32.mrf.mxu0  ;;  %v1068_v35 = vpop.f32.mrf.mxu1 }
 0x106   : > { %856 = vst [vmem:[%s1265_s25 + $0x58] sm:$0xff] %v824_v30  ;;  %872 = vst [vmem:[%s1265_s25 + $0xd8] sm:$0xff] %v840_v31  ;;  %v822_v36 = vadd.f32 %v1258_v26, %v783_v32  ;;  %v788_v38 = vmul.f32 %v1052_v34, %v1252_v24  ;;  %v804_v39 = vmul.f32 %v1068_v35, %v1252_v24 }
 0x107   : > { %v838_v37 = vadd.f32 %v1258_v26, %v799_v33  ;;  %v589_v40 = vpop.f32.mrf.mxu0  ;;  %v653_v41 = vpop.f32.mrf.mxu1 }
 0x108   : > { %854 = vst [vmem:[%s1265_s25 + $0x48] sm:$0xff] %v822_v36  ;;  %v827_v42 = vadd.f32 %v1258_v26, %v788_v38  ;;  %v843_v43 = vadd.f32 %v1258_v26, %v804_v39  ;;  %v786_v44 = vmul.f32 %v1252_v24, %v589_v40  ;;  %v802_v45 = vmul.f32 %v1252_v24, %v653_v41 }
 0x109   : > { %870 = vst [vmem:[%s1265_s25 + $0xc8] sm:$0xff] %v838_v37  ;;  %v1053_v46 = vpop.f32.mrf.mxu0  ;;  %v1069_v47 = vpop.f32.mrf.mxu1 }
 0x10a   : > { %859 = vst [vmem:[%s1265_s25 + $0x70] sm:$0xff] %v827_v42  ;;  %875 = vst [vmem:[%s1265_s25 + $0xf0] sm:$0xff] %v843_v43  ;;  %v825_v48 = vadd.f32 %v1258_v26, %v786_v44  ;;  %v841_v49 = vadd.f32 %v1258_v26, %v802_v45  ;;  %v789_v50 = vmul.f32 %v1053_v46, %v1252_v24 }
 0x10b   : > { %v805_v51 = vmul.f32 %v1069_v47, %v1252_v24  ;;  %v592_v52 = vpop.f32.mrf.mxu0  ;;  %v656_v53 = vpop.f32.mrf.mxu1 }
 0x10c   : > { %857 = vst [vmem:[%s1265_s25 + $0x60] sm:$0xff] %v825_v48  ;;  %873 = vst [vmem:[%s1265_s25 + $0xe0] sm:$0xff] %v841_v49  ;;  %v828_v54 = vadd.f32 %v1258_v26, %v789_v50  ;;  %v787_v56 = vmul.f32 %v1252_v24, %v592_v52  ;;  %v803_v57 = vmul.f32 %v1252_v24, %v656_v53 }
 0x10d   : > { %v844_v55 = vadd.f32 %v1258_v26, %v805_v51 }
 0x10e   : > { %860 = vst [vmem:[%s1265_s25 + $0x78] sm:$0xff] %v828_v54  ;;  %v826_v58 = vadd.f32 %v1258_v26, %v787_v56  ;;  %v842_v59 = vadd.f32 %v1258_v26, %v803_v57 }
 0x10f   : > { %876 = vst [vmem:[%s1265_s25 + $0xf8] sm:$0xff] %v844_v55 }
 0x110   : > { %858 = vst [vmem:[%s1265_s25 + $0x68] sm:$0xff] %v826_v58  ;;  %874 = vst [vmem:[%s1265_s25 + $0xe8] sm:$0xff] %v842_v59 }
 0x111 PF: > { %s14_s17 = sadd.s32 1, %s1156_s17   ;;  %s1375_s15 = smov %s1152_s16 }
 0x112   : > { %p11_p5 = scmp.ge.s32.totalorder %s14_s17, 4   ;;  %s1376_s16 = smov %s1378_s18 }
 0x114   :  { %13 = sbr.rel (!%p11_p5) target bundleno = 2 (0x2), region = 77 }

// kernel: residual_block_forward.5
= control target key start
LH: loop header
LB: loop body
LE: loop exit
PB: predicated region body
PF: predicated region fallthrough
CT: control target
= control target key end

     0   :  { %s1347_s18 = smov 0   ;;  %s1349_s19 = smov 0   ;;  %s1571_s0 = inlined_call_operand.vmem [shape: bf16[512,128], index: 0, kind: input, shape index: {}]   ;;  %s1572_s1 = inlined_call_operand.vmem [shape: bf16[128,128], index: 1, kind: input, shape index: {}]   ;;  %s1573_s2 = inlined_call_operand.vmem [shape: f32[1,128], index: 2, kind: input, shape index: {}]   ;;  %s1574_s3 = inlined_call_operand.vmem [shape: f32[1,128], index: 3, kind: input, shape index: {}]   ;;  %s1575_s4 = inlined_call_operand.vmem [shape: f32[512,128], index: 4, kind: input, shape index: {}]   ;;  %s1576_s5 = inlined_call_operand.vmem [shape: f32[512,128], index: 5, kind: output, shape index: {}]  }
   0x1   :  { %s1351_s20 = smov 0  }
   0x2 LB: > { %s27_s21 = sadd.s32 1, %s1311_s19  ;;  %p1122_p0 = scmp.ge.s32.totalorder %s1315_s20, 1  ;;  %s1315_s20 = sphi %s1351_s20, %s15_s20   ;;  %s1311_s19 = sphi %s1349_s19, %s1578_s19   ;;  %s1307_s18 = sphi %s1347_s18, %s1577_s18  }
   0x3   : > { %p29_p1 = scmp.ge.s32.totalorder %s27_s21, 2  ;;  %p227_p2 = scmp.lt.s32.totalorder %s1315_s20, 3 }
   0x5   : > { %s1580_s21 = smov (%p29_p1, %s27_s21), 0  ;;  %p228_p3 = pnand %p1122_p0, %p227_p2 }
   0x6   : > { %s1123_s24 = sshll.u32 (!%p228_p3), %s1307_s18, 5 }
   0x7   : > { %231 = sbr.rel (%p228_p3) target bundleno = 279 (0x117), region = 40  ;;  %p269_p4 = scmp.lt.s32.totalorder (!%p228_p3), %s1123_s24, 63 }
   0xc   : > { %v1269_v0 = vld [vmem:[%s1572_s1 + $0x38] sm:$0xff]   ;;  %v1270_v1 = vld [vmem:[%s1572_s1 + $0x30] sm:$0xff]   ;;  %s1582_s24 = smov (!%p269_p4, %s1123_s24), 63  ;;  %v1271_v2 = vld [vmem:[%s1572_s1 + $0x28] sm:$0xff]  }
   0xd   : > { %1181 = vmatprep.subr.bf16.mxu0 %v1269_v0  ;;  %1229 = vmatprep.subr.bf16.mxu1 %v1269_v0  ;;  %s1124_s29 = sshll.u32 %s1582_s24, 2  ;;  %v1272_v3 = vld [vmem:[%s1572_s1 + $0x20] sm:$0xff]   ;;  %v1273_v6 = vld [vmem:[%s1572_s1 + $0x18] sm:$0xff]   ;;  %v1274_v7 = vld [vmem:[%s1572_s1 + $0x10] sm:$0xff]   ;;  %s1126_s18 = sshll.u32 %s1582_s24, 3 }
   0xe   : > { %1182 = vmatpush3.bf16.msra.mxu0 %v1269_v0  ;;  %1237 = vmatpush3.bf16.msra.mxu1 %v1269_v0  ;;  %s1380_s7 = scalar_lea.vmem %s1571_s0, %s1124_s29  ;;  %v1275_v8 = vld [vmem:[%s1572_s1 + $0x8] sm:$0xff]   ;;  %v1276_v9 = vld [vmem:[%s1572_s1] sm:$0xff]   ;;  %s1422_s27 = scalar_lea.vmem %s1575_s4, %s1126_s18 }
   0xf   : > { %1183 = vmatprep.subr.bf16.mxu0 %v1270_v1  ;;  %1230 = vmatprep.subr.bf16.mxu1 %v1270_v1  ;;  %v1277_v4 = vld [vmem:[%s1380_s7] sm:$0xff]   ;;  %v1279_v10 = vld [vmem:[%s1380_s7 + $0x8] sm:$0xff]   ;;  %v1281_v12 = vld [vmem:[%s1380_s7 + $0x10] sm:$0xff]   ;;  %s1444_s6 = scalar_lea.vmem %s1576_s5, %s1126_s18 }
  0x10   : > { %v1278_v5 = vld [vmem:[%s1380_s7 + $0x40] sm:$0xff]   ;;  %1197 = vmatprep.mubr.bf16.mxu0 %v1277_v4  ;;  %v1280_v11 = vld [vmem:[%s1380_s7 + $0x48] sm:$0xff]   ;;  %v1282_v13 = vld [vmem:[%s1380_s7 + $0x50] sm:$0xff]  }
  0x11   : > { %1213 = vmatprep.mubr.bf16.mxu1 %v1278_v5  ;;  %v1283_v14 = vld [vmem:[%s1380_s7 + $0x18] sm:$0xff]   ;;  %v1285_v16 = vld [vmem:[%s1380_s7 + $0x20] sm:$0xff]   ;;  %v1287_v18 = vld [vmem:[%s1380_s7 + $0x28] sm:$0xff]  }
  0x12   : > { %1184 = vmatpush3.bf16.msra.mxu0 %v1270_v1  ;;  %1238 = vmatpush3.bf16.msra.mxu1 %v1270_v1  ;;  %v1284_v15 = vld [vmem:[%s1380_s7 + $0x58] sm:$0xff]   ;;  %v1286_v17 = vld [vmem:[%s1380_s7 + $0x60] sm:$0xff]   ;;  %v1288_v19 = vld [vmem:[%s1380_s7 + $0x68] sm:$0xff]  }
  0x13   : > { %1185 = vmatprep.subr.bf16.mxu0 %v1271_v2  ;;  %1231 = vmatprep.subr.bf16.mxu1 %v1271_v2  ;;  %v1289_v20 = vld [vmem:[%s1380_s7 + $0x30] sm:$0xff]   ;;  %v1291_v22 = vld [vmem:[%s1380_s7 + $0x38] sm:$0xff]   ;;  %v1417_v24 = vld [vmem:[%s1573_s2] ss:$0 sm:$0xff] }
  0x14   : > { %v1290_v21 = vld [vmem:[%s1380_s7 + $0x70] sm:$0xff]   ;;  %v1292_v23 = vld [vmem:[%s1380_s7 + $0x78] sm:$0xff]   ;;  %v1427_v26 = vld [vmem:[%s1574_s3] ss:$0 sm:$0xff] }
  0x15   : > { %v896_v30 = vld [vmem:[%s1422_s27 + $0x10] sm:$0xff]  ;;  %v894_v38 = vld [vmem:[%s1422_s27] sm:$0xff]  ;;  %v897_v54 = vld [vmem:[%s1422_s27 + $0x18] sm:$0xff] }
  0x16   : > { %1186 = vmatpush3.bf16.msra.mxu0 %v1271_v2  ;;  %1239 = vmatpush3.bf16.msra.mxu1 %v1271_v2  ;;  %v912_v31 = vld [vmem:[%s1422_s27 + $0x90] sm:$0xff]  ;;  %v910_v39 = vld [vmem:[%s1422_s27 + $0x80] sm:$0xff]  ;;  %v913_v55 = vld [vmem:[%s1422_s27 + $0x98] sm:$0xff] }
  0x17   : > { %1187 = vmatprep.subr.bf16.mxu0 %v1272_v3  ;;  %1232 = vmatprep.subr.bf16.mxu1 %v1272_v3  ;;  %v895_v0 = vld [vmem:[%s1422_s27 + $0x8] sm:$0xff] }
  0x18   : > { %v911_v1 = vld [vmem:[%s1422_s27 + $0x88] sm:$0xff] }
  0x1a   : > { %1188 = vmatpush3.bf16.msra.mxu0 %v1272_v3  ;;  %1240 = vmatpush3.bf16.msra.mxu1 %v1272_v3 }
  0x1b   : > { %1189 = vmatprep.subr.bf16.mxu0 %v1273_v6  ;;  %1233 = vmatprep.subr.bf16.mxu1 %v1273_v6 }
  0x1e   : > { %1190 = vmatpush3.bf16.msra.mxu0 %v1273_v6  ;;  %1241 = vmatpush3.bf16.msra.mxu1 %v1273_v6 }
  0x1f   : > { %1191 = vmatprep.subr.bf16.mxu0 %v1274_v7  ;;  %1234 = vmatprep.subr.bf16.mxu1 %v1274_v7 }
  0x22   : > { %1192 = vmatpush3.bf16.msra.mxu0 %v1274_v7  ;;  %1242 = vmatpush3.bf16.msra.mxu1 %v1274_v7 }
  0x23   : > { %1193 = vmatprep.subr.bf16.mxu0 %v1275_v8  ;;  %1235 = vmatprep.subr.bf16.mxu1 %v1275_v8 }
  0x26   : > { %1194 = vmatpush3.bf16.msra.mxu0 %v1275_v8  ;;  %1243 = vmatpush3.bf16.msra.mxu1 %v1275_v8  ;;  %v900_v8 = vld [vmem:[%s1422_s27 + $0x30] sm:$0xff] }
  0x27   : > { %1195 = vmatprep.subr.bf16.mxu0 %v1276_v9  ;;  %1236 = vmatprep.subr.bf16.mxu1 %v1276_v9 }
  0x2a   : > { %1196 = vmatpush3.bf16.msra.mxu0 %v1276_v9  ;;  %1244 = vmatpush3.bf16.msra.mxu1 %v1276_v9  ;;  %v916_v9 = vld [vmem:[%s1422_s27 + $0xb0] sm:$0xff] }
  0x2d   : > { %1198 = vmatmul.mubr.bf16.vlgmr.msra.gmra.mxu0 %v1279_v10  ;;  %1214 = vmatmul.mubr.bf16.vlgmr.msra.gmra.mxu1 %v1280_v11 }
  0x2e   : > { %1201 = vmatprep.mubr.bf16.mxu0 %v1281_v12  ;;  %1217 = vmatprep.mubr.bf16.mxu1 %v1282_v13 }
  0x35   : > { %1202 = vmatmul.mubr.bf16.gmra.mxu0 %v1283_v14  ;;  %1218 = vmatmul.mubr.bf16.gmra.mxu1 %v1284_v15 }
  0x36   : > { %1205 = vmatprep.mubr.bf16.mxu0 %v1285_v16  ;;  %1221 = vmatprep.mubr.bf16.mxu1 %v1286_v17 }
  0x3d   : > { %1206 = vmatmul.mubr.bf16.gmra.mxu0 %v1287_v18  ;;  %1222 = vmatmul.mubr.bf16.gmra.mxu1 %v1288_v19 }
  0x3e   : > { %1209 = vmatprep.mubr.bf16.mxu0 %v1289_v20  ;;  %1225 = vmatprep.mubr.bf16.mxu1 %v1290_v21  ;;  %v898_v20 = vld [vmem:[%s1422_s27 + $0x20] sm:$0xff] }
  0x3f   : > { %v914_v21 = vld [vmem:[%s1422_s27 + $0xa0] sm:$0xff] }
  0x45   : > { %1210 = vmatmul.mubr.bf16.gmra.mxu0 %v1291_v22  ;;  %1226 = vmatmul.mubr.bf16.gmra.mxu1 %v1292_v23 }
  0xed   : > { %v1199_v25 = vpop.f32.mrf.mxu0  ;;  %v1215_v27 = vpop.f32.mrf.mxu1 }
  0xee   : > { %v825_v28 = vmul.f32 %v1199_v25, %v1417_v24  ;;  %v841_v29 = vmul.f32 %v1215_v27, %v1417_v24 }
  0xef   : > { %v590_v32 = vpop.f32.mrf.mxu0  ;;  %v654_v33 = vpop.f32.mrf.mxu1 }
  0xf0   : > { %v864_v34 = vadd.f32 %v1427_v26, %v825_v28  ;;  %v880_v35 = vadd.f32 %v1427_v26, %v841_v29  ;;  %v823_v36 = vmul.f32 %v1417_v24, %v590_v32  ;;  %v839_v37 = vmul.f32 %v1417_v24, %v654_v33 }
  0xf1   : > { %v1200_v40 = vpop.f32.mrf.mxu0  ;;  %v1216_v41 = vpop.f32.mrf.mxu1 }
  0xf2   : > { %v928_v42 = vadd.f32 %v896_v30, %v864_v34  ;;  %v944_v43 = vadd.f32 %v912_v31, %v880_v35  ;;  %v862_v44 = vadd.f32 %v1427_v26, %v823_v36  ;;  %v878_v45 = vadd.f32 %v1427_v26, %v839_v37 }
  0xf3   : > { %v826_v46 = vmul.f32 %v1200_v40, %v1417_v24  ;;  %v842_v47 = vmul.f32 %v1216_v41, %v1417_v24  ;;  %v593_v48 = vpop.f32.mrf.mxu0  ;;  %v657_v49 = vpop.f32.mrf.mxu1  ;;  %v901_v40 = vld [vmem:[%s1422_s27 + $0x38] sm:$0xff] }
  0xf4   : > { %v960_v50 = vmax.f32 %v928_v42, 0.0  ;;  %v976_v51 = vmax.f32 %v944_v43, 0.0  ;;  %v926_v52 = vadd.f32 %v894_v38, %v862_v44  ;;  %v942_v53 = vadd.f32 %v910_v39, %v878_v45  ;;  %v917_v41 = vld [vmem:[%s1422_s27 + $0xb8] sm:$0xff] }
  0xf5   : > { %v865_v56 = vadd.f32 %v1427_v26, %v826_v46  ;;  %v881_v57 = vadd.f32 %v1427_v26, %v842_v47  ;;  %v824_v58 = vmul.f32 %v1417_v24, %v593_v48  ;;  %v840_v59 = vmul.f32 %v1417_v24, %v657_v49  ;;  %v1203_v60 = vpop.f32.mrf.mxu0  ;;  %v1219_v61 = vpop.f32.mrf.mxu1 }
  0xf6   : > { %992 = vst [vmem:[%s1444_s6 + $0x10] sm:$0xff] %v960_v50  ;;  %1008 = vst [vmem:[%s1444_s6 + $0x90] sm:$0xff] %v976_v51  ;;  %v958_v62 = vmax.f32 %v926_v52, 0.0  ;;  %v974_v63 = vmax.f32 %v942_v53, 0.0  ;;  %v829_v2 = vmul.f32 %v1203_v60, %v1417_v24  ;;  %v845_v3 = vmul.f32 %v1219_v61, %v1417_v24  ;;  %v899_v50 = vld [vmem:[%s1422_s27 + $0x28] sm:$0xff] }
  0xf7   : > { %v929_v4 = vadd.f32 %v897_v54, %v865_v56  ;;  %v945_v5 = vadd.f32 %v913_v55, %v881_v57  ;;  %v863_v6 = vadd.f32 %v1427_v26, %v824_v58  ;;  %v879_v7 = vadd.f32 %v1427_v26, %v840_v59  ;;  %v606_v10 = vpop.f32.mrf.mxu0  ;;  %v670_v11 = vpop.f32.mrf.mxu1  ;;  %v915_v51 = vld [vmem:[%s1422_s27 + $0xa8] sm:$0xff]  ;;  %v904_v58 = vld [vmem:[%s1422_s27 + $0x50] sm:$0xff] }
  0xf8   : > { %990 = vst [vmem:[%s1444_s6] sm:$0xff] %v958_v62  ;;  %1006 = vst [vmem:[%s1444_s6 + $0x80] sm:$0xff] %v974_v63  ;;  %v868_v12 = vadd.f32 %v1427_v26, %v829_v2  ;;  %v884_v13 = vadd.f32 %v1427_v26, %v845_v3  ;;  %v827_v14 = vmul.f32 %v1417_v24, %v606_v10  ;;  %v920_v59 = vld [vmem:[%s1422_s27 + $0xd0] sm:$0xff] }
  0xf9   : > { %v843_v15 = vmul.f32 %v1417_v24, %v670_v11  ;;  %v961_v16 = vmax.f32 %v929_v4, 0.0  ;;  %v977_v17 = vmax.f32 %v945_v5, 0.0  ;;  %v927_v18 = vadd.f32 %v895_v0, %v863_v6  ;;  %v1204_v22 = vpop.f32.mrf.mxu0  ;;  %v1220_v23 = vpop.f32.mrf.mxu1  ;;  %v902_v6 = vld [vmem:[%s1422_s27 + $0x40] sm:$0xff] }
  0xfa   : > { %v943_v19 = vadd.f32 %v911_v1, %v879_v7  ;;  %v932_v25 = vadd.f32 %v900_v8, %v868_v12  ;;  %v948_v27 = vadd.f32 %v916_v9, %v884_v13  ;;  %v866_v28 = vadd.f32 %v1427_v26, %v827_v14  ;;  %v918_v7 = vld [vmem:[%s1422_s27 + $0xc0] sm:$0xff] }
  0xfb   : > { %v882_v29 = vadd.f32 %v1427_v26, %v843_v15  ;;  %993 = vst [vmem:[%s1444_s6 + $0x18] sm:$0xff] %v961_v16  ;;  %1009 = vst [vmem:[%s1444_s6 + $0x98] sm:$0xff] %v977_v17  ;;  %v959_v30 = vmax.f32 %v927_v18, 0.0  ;;  %v830_v32 = vmul.f32 %v1204_v22, %v1417_v24  ;;  %v846_v33 = vmul.f32 %v1220_v23, %v1417_v24  ;;  %v609_v34 = vpop.f32.mrf.mxu0  ;;  %v673_v35 = vpop.f32.mrf.mxu1 }
  0xfc   : > { %v975_v31 = vmax.f32 %v943_v19, 0.0  ;;  %v964_v36 = vmax.f32 %v932_v25, 0.0  ;;  %v980_v37 = vmax.f32 %v948_v27, 0.0  ;;  %v930_v38 = vadd.f32 %v898_v20, %v866_v28  ;;  %v905_v25 = vld [vmem:[%s1422_s27 + $0x58] sm:$0xff] }
  0xfd   : > { %v946_v39 = vadd.f32 %v914_v21, %v882_v29  ;;  %991 = vst [vmem:[%s1444_s6 + $0x8] sm:$0xff] %v959_v30  ;;  %v869_v42 = vadd.f32 %v1427_v26, %v830_v32  ;;  %v885_v43 = vadd.f32 %v1427_v26, %v846_v33  ;;  %v828_v44 = vmul.f32 %v1417_v24, %v609_v34  ;;  %v1207_v46 = vpop.f32.mrf.mxu0  ;;  %v1223_v47 = vpop.f32.mrf.mxu1  ;;  %v921_v27 = vld [vmem:[%s1422_s27 + $0xd8] sm:$0xff] }
  0xfe   : > { %1007 = vst [vmem:[%s1444_s6 + $0x88] sm:$0xff] %v975_v31  ;;  %v844_v45 = vmul.f32 %v1417_v24, %v673_v35  ;;  %996 = vst [vmem:[%s1444_s6 + $0x30] sm:$0xff] %v964_v36  ;;  %v962_v48 = vmax.f32 %v930_v38, 0.0  ;;  %v833_v52 = vmul.f32 %v1207_v46, %v1417_v24  ;;  %v849_v53 = vmul.f32 %v1223_v47, %v1417_v24  ;;  %v903_v36 = vld [vmem:[%s1422_s27 + $0x48] sm:$0xff] }
  0xff   : > { %1012 = vst [vmem:[%s1444_s6 + $0xb0] sm:$0xff] %v980_v37  ;;  %v978_v49 = vmax.f32 %v946_v39, 0.0  ;;  %v933_v54 = vadd.f32 %v901_v40, %v869_v42  ;;  %v949_v55 = vadd.f32 %v917_v41, %v885_v43  ;;  %v867_v56 = vadd.f32 %v1427_v26, %v828_v44  ;;  %v622_v60 = vpop.f32.mrf.mxu0  ;;  %v686_v61 = vpop.f32.mrf.mxu1  ;;  %v919_v37 = vld [vmem:[%s1422_s27 + $0xc8] sm:$0xff]  ;;  %v908_v44 = vld [vmem:[%s1422_s27 + $0x70] sm:$0xff] }
 0x100   : > { %v883_v57 = vadd.f32 %v1427_v26, %v844_v45  ;;  %994 = vst [vmem:[%s1444_s6 + $0x20] sm:$0xff] %v962_v48  ;;  %v872_v62 = vadd.f32 %v1427_v26, %v833_v52  ;;  %v888_v63 = vadd.f32 %v1427_v26, %v849_v53  ;;  %v831_v0 = vmul.f32 %v1417_v24, %v622_v60  ;;  %v924_v45 = vld [vmem:[%s1422_s27 + $0xf0] sm:$0xff] }
 0x101   : > { %1010 = vst [vmem:[%s1444_s6 + $0xa0] sm:$0xff] %v978_v49  ;;  %v847_v1 = vmul.f32 %v1417_v24, %v686_v61  ;;  %v965_v2 = vmax.f32 %v933_v54, 0.0  ;;  %v981_v3 = vmax.f32 %v949_v55, 0.0  ;;  %v931_v4 = vadd.f32 %v899_v50, %v867_v56  ;;  %v1208_v8 = vpop.f32.mrf.mxu0  ;;  %v1224_v9 = vpop.f32.mrf.mxu1  ;;  %v906_v56 = vld [vmem:[%s1422_s27 + $0x60] sm:$0xff] }
 0x102   : > { %v947_v5 = vadd.f32 %v915_v51, %v883_v57  ;;  %v936_v10 = vadd.f32 %v904_v58, %v872_v62  ;;  %v952_v11 = vadd.f32 %v920_v59, %v888_v63  ;;  %v870_v12 = vadd.f32 %v1427_v26, %v831_v0  ;;  %v922_v57 = vld [vmem:[%s1422_s27 + $0xe0] sm:$0xff] }
 0x103   : > { %v886_v13 = vadd.f32 %v1427_v26, %v847_v1  ;;  %997 = vst [vmem:[%s1444_s6 + $0x38] sm:$0xff] %v965_v2  ;;  %1013 = vst [vmem:[%s1444_s6 + $0xb8] sm:$0xff] %v981_v3  ;;  %v963_v14 = vmax.f32 %v931_v4, 0.0  ;;  %v834_v16 = vmul.f32 %v1208_v8, %v1417_v24  ;;  %v850_v17 = vmul.f32 %v1224_v9, %v1417_v24  ;;  %v625_v18 = vpop.f32.mrf.mxu0  ;;  %v689_v19 = vpop.f32.mrf.mxu1 }
 0x104   : > { %v979_v15 = vmax.f32 %v947_v5, 0.0  ;;  %v968_v20 = vmax.f32 %v936_v10, 0.0  ;;  %v984_v21 = vmax.f32 %v952_v11, 0.0  ;;  %v934_v22 = vadd.f32 %v902_v6, %v870_v12  ;;  %v909_v10 = vld [vmem:[%s1422_s27 + $0x78] sm:$0xff] }
 0x105   : > { %v950_v23 = vadd.f32 %v918_v7, %v886_v13  ;;  %995 = vst [vmem:[%s1444_s6 + $0x28] sm:$0xff] %v963_v14  ;;  %v873_v28 = vadd.f32 %v1427_v26, %v834_v16  ;;  %v889_v29 = vadd.f32 %v1427_v26, %v850_v17  ;;  %v832_v30 = vmul.f32 %v1417_v24, %v625_v18  ;;  %v1211_v32 = vpop.f32.mrf.mxu0  ;;  %v1227_v33 = vpop.f32.mrf.mxu1  ;;  %v925_v11 = vld [vmem:[%s1422_s27 + $0xf8] sm:$0xff]  ;;  %v907_v18 = vld [vmem:[%s1422_s27 + $0x68] sm:$0xff] }
 0x106   : > { %1011 = vst [vmem:[%s1444_s6 + $0xa8] sm:$0xff] %v979_v15  ;;  %v848_v31 = vmul.f32 %v1417_v24, %v689_v19  ;;  %1000 = vst [vmem:[%s1444_s6 + $0x50] sm:$0xff] %v968_v20  ;;  %v966_v34 = vmax.f32 %v934_v22, 0.0  ;;  %v837_v38 = vmul.f32 %v1211_v32, %v1417_v24  ;;  %v853_v39 = vmul.f32 %v1227_v33, %v1417_v24  ;;  %v923_v19 = vld [vmem:[%s1422_s27 + $0xe8] sm:$0xff] }
 0x107   : > { %1016 = vst [vmem:[%s1444_s6 + $0xd0] sm:$0xff] %v984_v21  ;;  %v982_v35 = vmax.f32 %v950_v23, 0.0  ;;  %v937_v40 = vadd.f32 %v905_v25, %v873_v28  ;;  %v953_v41 = vadd.f32 %v921_v27, %v889_v29  ;;  %v871_v42 = vadd.f32 %v1427_v26, %v832_v30  ;;  %v638_v46 = vpop.f32.mrf.mxu0  ;;  %v702_v47 = vpop.f32.mrf.mxu1 }
 0x108   : > { %v887_v43 = vadd.f32 %v1427_v26, %v848_v31  ;;  %998 = vst [vmem:[%s1444_s6 + $0x40] sm:$0xff] %v966_v34  ;;  %v876_v48 = vadd.f32 %v1427_v26, %v837_v38  ;;  %v892_v49 = vadd.f32 %v1427_v26, %v853_v39  ;;  %v835_v50 = vmul.f32 %v1417_v24, %v638_v46 }
 0x109   : > { %1014 = vst [vmem:[%s1444_s6 + $0xc0] sm:$0xff] %v982_v35  ;;  %v851_v51 = vmul.f32 %v1417_v24, %v702_v47  ;;  %v969_v52 = vmax.f32 %v937_v40, 0.0  ;;  %v985_v53 = vmax.f32 %v953_v41, 0.0  ;;  %v935_v54 = vadd.f32 %v903_v36, %v871_v42  ;;  %v1212_v58 = vpop.f32.mrf.mxu0  ;;  %v1228_v59 = vpop.f32.mrf.mxu1 }
 0x10a   : > { %v951_v55 = vadd.f32 %v919_v37, %v887_v43  ;;  %v940_v60 = vadd.f32 %v908_v44, %v876_v48  ;;  %v956_v61 = vadd.f32 %v924_v45, %v892_v49  ;;  %v874_v62 = vadd.f32 %v1427_v26, %v835_v50 }
 0x10b   : > { %v890_v63 = vadd.f32 %v1427_v26, %v851_v51  ;;  %1001 = vst [vmem:[%s1444_s6 + $0x58] sm:$0xff] %v969_v52  ;;  %1017 = vst [vmem:[%s1444_s6 + $0xd8] sm:$0xff] %v985_v53  ;;  %v967_v0 = vmax.f32 %v935_v54, 0.0  ;;  %v838_v2 = vmul.f32 %v1212_v58, %v1417_v24  ;;  %v854_v3 = vmul.f32 %v1228_v59, %v1417_v24  ;;  %v641_v4 = vpop.f32.mrf.mxu0  ;;  %v705_v5 = vpop.f32.mrf.mxu1 }
 0x10c   : > { %v983_v1 = vmax.f32 %v951_v55, 0.0  ;;  %v972_v6 = vmax.f32 %v940_v60, 0.0  ;;  %v988_v7 = vmax.f32 %v956_v61, 0.0  ;;  %v938_v8 = vadd.f32 %v906_v56, %v874_v62 }
 0x10d   : > { %v954_v9 = vadd.f32 %v922_v57, %v890_v63  ;;  %999 = vst [vmem:[%s1444_s6 + $0x48] sm:$0xff] %v967_v0  ;;  %v877_v12 = vadd.f32 %v1427_v26, %v838_v2  ;;  %v893_v13 = vadd.f32 %v1427_v26, %v854_v3  ;;  %v836_v14 = vmul.f32 %v1417_v24, %v641_v4 }
 0x10e   : > { %1015 = vst [vmem:[%s1444_s6 + $0xc8] sm:$0xff] %v983_v1  ;;  %v852_v15 = vmul.f32 %v1417_v24, %v705_v5  ;;  %1004 = vst [vmem:[%s1444_s6 + $0x70] sm:$0xff] %v972_v6  ;;  %v970_v16 = vmax.f32 %v938_v8, 0.0 }
 0x10f   : > { %1020 = vst [vmem:[%s1444_s6 + $0xf0] sm:$0xff] %v988_v7  ;;  %v986_v17 = vmax.f32 %v954_v9, 0.0  ;;  %v941_v20 = vadd.f32 %v909_v10, %v877_v12  ;;  %v957_v21 = vadd.f32 %v925_v11, %v893_v13  ;;  %v875_v22 = vadd.f32 %v1427_v26, %v836_v14 }
 0x110   : > { %v891_v23 = vadd.f32 %v1427_v26, %v852_v15  ;;  %1002 = vst [vmem:[%s1444_s6 + $0x60] sm:$0xff] %v970_v16 }
 0x111   : > { %1018 = vst [vmem:[%s1444_s6 + $0xe0] sm:$0xff] %v986_v17  ;;  %v973_v25 = vmax.f32 %v941_v20, 0.0  ;;  %v989_v24 = vmax.f32 %v957_v21, 0.0  ;;  %v939_v27 = vadd.f32 %v907_v18, %v875_v22 }
 0x112   : > { %v955_v28 = vadd.f32 %v923_v19, %v891_v23 }
 0x113   : > { %1005 = vst [vmem:[%s1444_s6 + $0x78] sm:$0xff] %v973_v25  ;;  %1021 = vst [vmem:[%s1444_s6 + $0xf8] sm:$0xff] %v989_v24  ;;  %v971_v29 = vmax.f32 %v939_v27, 0.0 }
 0x114   : > { %v987_v30 = vmax.f32 %v955_v28, 0.0 }
 0x115   : > { %1003 = vst [vmem:[%s1444_s6 + $0x68] sm:$0xff] %v971_v29 }
 0x116   : > { %1019 = vst [vmem:[%s1444_s6 + $0xe8] sm:$0xff] %v987_v30 }
 0x117 PF: > { %s15_s20 = sadd.s32 1, %s1315_s20   ;;  %s1577_s18 = smov %s1311_s19 }
 0x118   : > { %p12_p5 = scmp.ge.s32.totalorder %s15_s20, 4   ;;  %s1578_s19 = smov %s1580_s21 }
 0x11a   :  { %14 = sbr.rel (!%p12_p5) target bundleno = 2 (0x2), region = 84 }

</bundles_post_ra>
